<compile_context>
chip_gen: v6e
topology: v6e:2x2x1
jax: 0.10.0
libtpu: 0.0.40
codegen_flags: <defaults>
</compile_context>

<pallas_src>
import functools

import jax
import jax.numpy as jnp
from jax import lax
from jax.experimental import pallas as pl
from jax.experimental.pallas import tpu as pltpu


# --------------------------------------------------------------------------- #
# Kernel                                                                      #
# --------------------------------------------------------------------------- #
def _double_conv_kernel(x_ref, w1_ref, b1_ref, w2_ref, b2_ref, o_ref):
    # x_ref : (1, 1, SH+4, W+2, Cin) bf16  input strip, already carrying the
    #         SAME-conv halo (zeros at the image border, real rows elsewhere).
    # w1_ref: (9*Cin,  Cmid) bf16  conv1 weight, tap-major rows, BN1 scale folded in.
    # b1_ref: (1, Cmid)      f32   folded conv1 bias + BN1 shift.
    # w2_ref: (9*Cmid, Cout) bf16  conv2 weight, BN2 scale folded in.
    # b2_ref: (1, Cout)      f32
    # o_ref : (1, Cout, SH*W)      NCHW output strip, lane-dense (SH*W % 128 == 0).
    xs = x_ref[0, 0]                          # (SH+4, W+2, Cin)
    sh_p4, w_p2, cin = xs.shape
    sh, w = sh_p4 - 4, w_p2 - 2
    h1 = sh + 2                               # conv1 rows: strip + 1-row halo per side
    cmid = w1_ref.shape[1]

    def im2col(src, out_h, out_w, c):
        # 9 static tap slices, lane-concatenated -> one fused-K matmul operand.
        taps = [src[kh:kh + out_h, kw:kw + out_w, :]
                for kh in range(3) for kw in range(3)]
        return jnp.concatenate(taps, axis=-1).reshape(out_h * out_w, 9 * c)

    # ---- conv1 (+ folded BN1) -> ReLU over strip + 1-row halo ---------------
    h = jnp.dot(im2col(xs, h1, w, cin), w1_ref[...],
                preferred_element_type=jnp.float32)
    h = jnp.maximum(h + b1_ref[...], 0.0).reshape(h1, w, cmid)

    # conv2's SAME padding needs genuine zeros outside the image; the halo rows
    # of h at the image top/bottom were computed from the zero-padded input
    # (= ReLU(bias), not zero), so replace just those rows (O(perimeter) work).
    s = pl.program_id(1)
    top = jnp.where(s > 0, h[:1], 0.0)
    bot = jnp.where(s < pl.num_programs(1) - 1, h[-1:], 0.0)
    h = jnp.concatenate([top, h[1:-1], bot], axis=0).astype(jnp.bfloat16)

    # W halo for conv2: two zero columns.
    zc = jnp.zeros((h1, 1, cmid), jnp.bfloat16)
    hp = jnp.concatenate([zc, h, zc], axis=1)             # (H1, W+2, Cmid)

    # ---- conv2 (+ folded BN2) -> ReLU ---------------------------------------
    y = jnp.dot(im2col(hp, sh, w, cmid), w2_ref[...],
                preferred_element_type=jnp.float32)
    y = jnp.maximum(y + b2_ref[...], 0.0)                  # (SH*W, Cout) f32

    # Lane-dense NCHW store: one 2-D transpose puts Cout on sublanes and the
    # flattened (row, col) axis on lanes; the store is an unmasked full-width
    # vst and the wrapper needs no HBM transpose pass.
    o_ref[0] = y.T.astype(o_ref.dtype)


# --------------------------------------------------------------------------- #
# Wrapper helpers                                                             #
# --------------------------------------------------------------------------- #
def _fold_bn_into_conv(w_oihw, conv_bias, gamma, beta, mean, var, eps=1e-5):
    """Fold eval-mode BN (and the conv bias) into the conv weight and a bias.

    Returns:
      w_flat: (9*I, O) bf16, rows ordered (kh, kw, i), BN scale multiplied into
              each output-channel column (f32 math, then bf16 cast).
      bias  : (1, O) f32.
    """
    scale = gamma / jnp.sqrt(var + eps)
    bias = beta + (conv_bias - mean) * scale
    o, i, kh, kw = w_oihw.shape
    w_flat = jnp.transpose(w_oihw, (2, 3, 1, 0)).reshape(kh * kw * i, o)
    w_flat = (w_flat * scale[None, :]).astype(jnp.bfloat16)
    return w_flat, bias.reshape(1, o).astype(jnp.float32)


def _strip_vmem_bytes(sh, w, cin, cmid, cout, out_itemsize):
    """Rough per-grid-step VMEM working set (values + pipeline buffers)."""
    h1 = sh + 2
    return (h1 * w * 9 * cin * 2                       # cols1 (bf16)
            + h1 * w * cmid * 4                        # h (f32)
            + h1 * (w + 2) * cmid * 2                  # padded h (bf16)
            + sh * w * 9 * cmid * 2                    # cols2 (bf16)
            + sh * w * cout * 4                        # y (f32)
            + 2 * (sh + 4) * (w + 2) * cin * 2         # x strip (double-buffered)
            + 2 * cout * sh * w * out_itemsize         # out strip (double-buffered)
            + 2 * 9 * (cin * cmid + cmid * cout) * 2)  # weights (double-buffered)


def _choose_strip_height(h, w, cin, cmid, cout, out_itemsize, budget):
    """Largest strip height that (a) divides H, (b) keeps the out block lane-dense
    (strip_H*W % 128 == 0), (c) fits the VMEM budget, and (d) leaves >= 2 grid
    steps along H when possible (pipelining / megacore)."""
    bytes_of = lambda d: _strip_vmem_bytes(d, w, cin, cmid, cout, out_itemsize)
    divisors = [d for d in range(1, h + 1) if h % d == 0]
    valid = [d for d in divisors if d == h or (d * w) % 128 == 0]
    fits = [d for d in valid if bytes_of(d) <= budget]
    pool = fits or [min(valid, key=bytes_of)]          # best effort if nothing fits
    multi = [d for d in pool if h // d >= 2]
    return max(multi or pool)


def _vmem_budget():
    """Per-chip scoped-VMEM limit and per-step tile budget (static, trace time)."""
    try:
        info = pltpu.get_tpu_info()
        cap = int(getattr(info, "vmem_capacity_bytes", 0)) or 64 * 1024 * 1024
    except Exception:
        cap = 64 * 1024 * 1024                          # conservative (v7x)
    # 48 MiB scoped limit on v7x (64 MiB VMEM), 96 MiB on v5e/v6e (128 MiB VMEM);
    # keep 12 MiB of that as headroom for Mosaic internal scratch.
    limit = min(cap - 16 * 1024 * 1024, 96 * 1024 * 1024)
    return limit, limit - 12 * 1024 * 1024


# --------------------------------------------------------------------------- #
# Public entry point                                                          #
# --------------------------------------------------------------------------- #
@functools.partial(jax.jit, static_argnames=("out_dtype",))
def double_conv(x_nchw,
                w1_oihw, conv1_bias, bn1_gamma, bn1_beta, bn1_mean, bn1_var,
                w2_oihw, conv2_bias, bn2_gamma, bn2_beta, bn2_mean, bn2_var,
                out_dtype=jnp.float32):
    """Eval-mode DoubleConv forward.  x_nchw: (N, Cin, H, W) f32 -> (N, Cout, H, W).

    Pass out_dtype=jnp.bfloat16 to halve output writeback (recommended on v5e).
    """
    n, cin, h, w = x_nchw.shape
    cmid = w1_oihw.shape[0]
    cout = w2_oihw.shape[0]
    out_itemsize = jnp.dtype(out_dtype).itemsize

    vmem_limit, tile_budget = _vmem_budget()
    sh = _choose_strip_height(h, w, cin, cmid, cout, out_itemsize, tile_budget)
    n_strips = h // sh

    w1, b1 = _fold_bn_into_conv(w1_oihw, conv1_bias, bn1_gamma, bn1_beta,
                                bn1_mean, bn1_var)
    w2, b2 = _fold_bn_into_conv(w2_oihw, conv2_bias, bn2_gamma, bn2_beta,
                                bn2_mean, bn2_var)

    # NCHW -> NHWC, bf16 cast, SAME-conv zero halo (2 rows / 1 col per side) and
    # overlapping H-strip gather -- one fused XLA pass over the (small) input.
    x = jnp.transpose(x_nchw, (0, 2, 3, 1)).astype(jnp.bfloat16)
    x = jnp.pad(x, ((0, 0), (2, 2), (1, 1), (0, 0)))
    rows = jnp.arange(n_strips)[:, None] * sh + jnp.arange(sh + 4)[None, :]
    x_strips = x[:, rows]                                # (N, S, SH+4, W+2, Cin)

    flops = 2 * n * h * w * 9 * (cin * cmid + cmid * cout)
    bytes_accessed = (x_strips.size * 2 + (w1.size + w2.size) * 2
                      + (b1.size + b2.size) * 4 + n * cout * h * w * out_itemsize)

    out = pl.pallas_call(
        _double_conv_kernel,
        out_shape=jax.ShapeDtypeStruct((n, cout, h * w), out_dtype),
        grid=(n, n_strips),
        in_specs=[
            pl.BlockSpec((1, 1, sh + 4, w + 2, cin), lambda i, s: (i, s, 0, 0, 0)),
            pl.BlockSpec((9 * cin, cmid), lambda i, s: (0, 0)),
            pl.BlockSpec((1, cmid), lambda i, s: (0, 0)),
            pl.BlockSpec((9 * cmid, cout), lambda i, s: (0, 0)),
            pl.BlockSpec((1, cout), lambda i, s: (0, 0)),
        ],
        out_specs=pl.BlockSpec((1, cout, sh * w), lambda i, s: (i, 0, s)),
        compiler_params=pltpu.CompilerParams(
            # Batch elements and H-strips are independent -> shard across cores.
            dimension_semantics=("parallel", "parallel"),
            vmem_limit_bytes=vmem_limit,
        ),
        cost_estimate=pl.CostEstimate(
            flops=flops, transcendentals=0, bytes_accessed=bytes_accessed),
    )(x_strips, w1, b1, w2, b2)

    # (N, Cout, H*W) -> (N, Cout, H, W): pure metadata reshape, no HBM pass.
    return out.reshape(n, cout, h, w)


# --------------------------------------------------------------------------- #
# Pure-JAX reference (matches the kernel's quantization points)               #
# --------------------------------------------------------------------------- #
def _reference(x_nchw, w1_oihw, cb1, g1, be1, m1, v1,
               w2_oihw, cb2, g2, be2, m2, v2):
    f32 = jnp.float32
    q = lambda a: a.astype(jnp.bfloat16).astype(f32)

    def fold(w_oihw, cb, g, be, m, v, eps=1e-5):
        scale = g / jnp.sqrt(v + eps)
        bias = be + (cb - m) * scale
        w_hwio = jnp.transpose(w_oihw, (2, 3, 1, 0)) * scale
        return q(w_hwio), bias

    def conv(a, w):
        return lax.conv_general_dilated(
            a, w, window_strides=(1, 1), padding="SAME",
            dimension_numbers=("NHWC", "HWIO", "NHWC"),
            precision=lax.Precision.HIGHEST)

    w1, b1 = fold(w1_oihw, cb1, g1, be1, m1, v1)
    w2, b2 = fold(w2_oihw, cb2, g2, be2, m2, v2)
    x = q(jnp.transpose(x_nchw, (0, 2, 3, 1)))
    h = q(jnp.maximum(conv(x, w1) + b1, 0.0))
    y = jnp.maximum(conv(h, w2) + b2, 0.0)
    return jnp.transpose(y, (0, 3, 1, 2))


if __name__ == "__main__":
    N, Cin, H, W = 2, 4, 16, 16
    Cmid = Cout = 8  # mid_channels defaults to out_channels

    key = jax.random.PRNGKey(0)
    ks = jax.random.split(key, 13)

    # PyTorch-shaped parameters (Conv2d weight: (out, in, 3, 3); bias: (out,))
    w1 = 0.1 * jax.random.normal(ks[0], (Cmid, Cin, 3, 3), jnp.float32)
    cb1 = 0.1 * jax.random.normal(ks[1], (Cmid,), jnp.float32)
    g1 = 1.0 + 0.1 * jax.random.normal(ks[2], (Cmid,), jnp.float32)
    be1 = 0.1 * jax.random.normal(ks[3], (Cmid,), jnp.float32)
    rm1 = 0.1 * jax.random.normal(ks[4], (Cmid,), jnp.float32)
    rv1 = 0.5 + 0.5 * jnp.abs(jax.random.normal(ks[5], (Cmid,), jnp.float32))

    w2 = 0.1 * jax.random.normal(ks[6], (Cout, Cmid, 3, 3), jnp.float32)
    cb2 = 0.1 * jax.random.normal(ks[7], (Cout,), jnp.float32)
    g2 = 1.0 + 0.1 * jax.random.normal(ks[8], (Cout,), jnp.float32)
    be2 = 0.1 * jax.random.normal(ks[9], (Cout,), jnp.float32)
    rm2 = 0.1 * jax.random.normal(ks[10], (Cout,), jnp.float32)
    rv2 = 0.5 + 0.5 * jnp.abs(jax.random.normal(ks[11], (Cout,), jnp.float32))

    x = jax.random.normal(ks[12], (N, Cin, H, W), jnp.float32)

    out = double_conv(x, w1, cb1, g1, be1, rm1, rv1,
                      w2, cb2, g2, be2, rm2, rv2)
    out = jax.block_until_ready(out)

    ref = _reference(x, w1, cb1, g1, be1, rm1, rv1,
                     w2, cb2, g2, be2, rm2, rv2)

    assert out.shape == (N, Cout, H, W)
    max_err = float(jnp.max(jnp.abs(out - ref)))
    assert jnp.allclose(out, ref, rtol=1e-2, atol=1e-2), max_err

    print("KERNEL_OK")
</pallas_src>

<mosaic_0001>
module attributes {stable_mosaic.version = 11 : i64} {
  func.func @_double_conv_kernel(%arg0: i32, %arg1: i32, %arg2: memref<1x1x12x18x4xbf16, #tpu.memory_space<vmem>>, %arg3: memref<36x8xbf16, #tpu.memory_space<vmem>>, %arg4: memref<1x8xf32, #tpu.memory_space<vmem>>, %arg5: memref<72x8xbf16, #tpu.memory_space<vmem>>, %arg6: memref<1x8xf32, #tpu.memory_space<vmem>>, %arg7: memref<1x8x128xf32, #tpu.memory_space<vmem>>) attributes {dimension_semantics = [#tpu.dimension_semantics<parallel>, #tpu.dimension_semantics<parallel>], iteration_bounds = array<i64: 2, 2>, scalar_prefetch = 0 : i64, scratch_operands = 0 : i64, tpu.core_type = #tpu.core_type<tc>, window_params = [{transform_indices = @transform_0, window_bounds = array<i64: 1, 1, 12, 18, 4>}, {pipeline_mode = #tpu.pipeline_mode<synchronous>, transform_indices = @transform_1, window_bounds = array<i64: 36, 8>}, {pipeline_mode = #tpu.pipeline_mode<synchronous>, transform_indices = @transform_2, window_bounds = array<i64: 1, 8>}, {pipeline_mode = #tpu.pipeline_mode<synchronous>, transform_indices = @transform_3, window_bounds = array<i64: 72, 8>}, {pipeline_mode = #tpu.pipeline_mode<synchronous>, transform_indices = @transform_4, window_bounds = array<i64: 1, 8>}, {transform_indices = @transform_5, window_bounds = array<i64: 1, 8, 128>}]} {
    %c0 = arith.constant 0 : index
    %c0_0 = arith.constant 0 : index
    %c0_1 = arith.constant 0 : index
    %c0_2 = arith.constant 0 : index
    %c0_3 = arith.constant 0 : index
    %0 = vector.load %arg2[%c0, %c0_0, %c0_1, %c0_2, %c0_3] : memref<1x1x12x18x4xbf16, #tpu.memory_space<vmem>>, vector<1x1x12x18x4xbf16>
    %1 = vector.shape_cast %0 : vector<1x1x12x18x4xbf16> to vector<12x18x4xbf16>
    %2 = vector.extract_strided_slice %1 {offsets = [0, 0, 0], sizes = [10, 16, 4], strides = [1, 1, 1]} : vector<12x18x4xbf16> to vector<10x16x4xbf16>
    %3 = vector.extract_strided_slice %1 {offsets = [0, 1, 0], sizes = [10, 16, 4], strides = [1, 1, 1]} : vector<12x18x4xbf16> to vector<10x16x4xbf16>
    %4 = vector.extract_strided_slice %1 {offsets = [0, 2, 0], sizes = [10, 16, 4], strides = [1, 1, 1]} : vector<12x18x4xbf16> to vector<10x16x4xbf16>
    %5 = vector.extract_strided_slice %1 {offsets = [1, 0, 0], sizes = [10, 16, 4], strides = [1, 1, 1]} : vector<12x18x4xbf16> to vector<10x16x4xbf16>
    %6 = vector.extract_strided_slice %1 {offsets = [1, 1, 0], sizes = [10, 16, 4], strides = [1, 1, 1]} : vector<12x18x4xbf16> to vector<10x16x4xbf16>
    %7 = vector.extract_strided_slice %1 {offsets = [1, 2, 0], sizes = [10, 16, 4], strides = [1, 1, 1]} : vector<12x18x4xbf16> to vector<10x16x4xbf16>
    %8 = vector.extract_strided_slice %1 {offsets = [2, 0, 0], sizes = [10, 16, 4], strides = [1, 1, 1]} : vector<12x18x4xbf16> to vector<10x16x4xbf16>
    %9 = vector.extract_strided_slice %1 {offsets = [2, 1, 0], sizes = [10, 16, 4], strides = [1, 1, 1]} : vector<12x18x4xbf16> to vector<10x16x4xbf16>
    %10 = vector.extract_strided_slice %1 {offsets = [2, 2, 0], sizes = [10, 16, 4], strides = [1, 1, 1]} : vector<12x18x4xbf16> to vector<10x16x4xbf16>
    %11 = tpu.concatenate %2, %3, %4, %5, %6, %7, %8, %9, %10 in 2 : vector<10x16x4xbf16>, vector<10x16x4xbf16>, vector<10x16x4xbf16>, vector<10x16x4xbf16>, vector<10x16x4xbf16>, vector<10x16x4xbf16>, vector<10x16x4xbf16>, vector<10x16x4xbf16>, vector<10x16x4xbf16> -> vector<10x16x36xbf16>
    %12 = vector.shape_cast %11 : vector<10x16x36xbf16> to vector<160x36xbf16>
    %c0_4 = arith.constant 0 : index
    %c0_5 = arith.constant 0 : index
    %13 = vector.load %arg3[%c0_4, %c0_5] : memref<36x8xbf16, #tpu.memory_space<vmem>>, vector<36x8xbf16>
    %cst = arith.constant dense<0.000000e+00> : vector<160x8xf32>
    %14 = tpu.matmul %12, %13, %cst {dimension_numbers = #tpu.dot_dimension_numbers<[1], [0], [0], [1], [0, 0, 1, 1], [], []>} : vector<160x36xbf16>, vector<36x8xbf16>, vector<160x8xf32> -> vector<160x8xf32>
    %c0_6 = arith.constant 0 : index
    %c0_7 = arith.constant 0 : index
    %15 = vector.load %arg4[%c0_6, %c0_7] : memref<1x8xf32, #tpu.memory_space<vmem>>, vector<1x8xf32>
    %16 = vector.broadcast %15 : vector<1x8xf32> to vector<160x8xf32>
    %17 = arith.addf %14, %16 : vector<160x8xf32>
    %cst_8 = arith.constant 0.000000e+00 : f32
    %18 = vector.broadcast %cst_8 : f32 to vector<160x8xf32>
    %19 = arith.maximumf %17, %18 : vector<160x8xf32>
    %20 = vector.shape_cast %19 : vector<160x8xf32> to vector<10x16x8xf32>
    %c0_i32 = arith.constant 0 : i32
    %21 = arith.cmpi sgt, %arg1, %c0_i32 : i32
    %22 = vector.extract_strided_slice %20 {offsets = [0, 0, 0], sizes = [1, 16, 8], strides = [1, 1, 1]} : vector<10x16x8xf32> to vector<1x16x8xf32>
    %cst_9 = arith.constant 0.000000e+00 : f32
    %23 = vector.broadcast %cst_9 : f32 to vector<1x16x8xf32>
    %24 = arith.select %21, %22, %23 : vector<1x16x8xf32>
    %c1_i32 = arith.constant 1 : i32
    %25 = arith.cmpi slt, %arg1, %c1_i32 : i32
    %26 = vector.extract_strided_slice %20 {offsets = [9, 0, 0], sizes = [1, 16, 8], strides = [1, 1, 1]} : vector<10x16x8xf32> to vector<1x16x8xf32>
    %cst_10 = arith.constant 0.000000e+00 : f32
    %27 = vector.broadcast %cst_10 : f32 to vector<1x16x8xf32>
    %28 = arith.select %25, %26, %27 : vector<1x16x8xf32>
    %29 = vector.extract_strided_slice %20 {offsets = [1, 0, 0], sizes = [8, 16, 8], strides = [1, 1, 1]} : vector<10x16x8xf32> to vector<8x16x8xf32>
    %30 = tpu.concatenate %24, %29, %28 in 0 : vector<1x16x8xf32>, vector<8x16x8xf32>, vector<1x16x8xf32> -> vector<10x16x8xf32>
    %31 = arith.truncf %30 : vector<10x16x8xf32> to vector<10x16x8xbf16>
    %cst_11 = arith.constant 0.000000e+00 : bf16
    %32 = vector.broadcast %cst_11 : bf16 to vector<10x1x8xbf16>
    %33 = tpu.concatenate %32, %31, %32 in 1 : vector<10x1x8xbf16>, vector<10x16x8xbf16>, vector<10x1x8xbf16> -> vector<10x18x8xbf16>
    %34 = vector.extract_strided_slice %33 {offsets = [0, 0, 0], sizes = [8, 16, 8], strides = [1, 1, 1]} : vector<10x18x8xbf16> to vector<8x16x8xbf16>
    %35 = vector.extract_strided_slice %33 {offsets = [0, 1, 0], sizes = [8, 16, 8], strides = [1, 1, 1]} : vector<10x18x8xbf16> to vector<8x16x8xbf16>
    %36 = vector.extract_strided_slice %33 {offsets = [0, 2, 0], sizes = [8, 16, 8], strides = [1, 1, 1]} : vector<10x18x8xbf16> to vector<8x16x8xbf16>
    %37 = vector.extract_strided_slice %33 {offsets = [1, 0, 0], sizes = [8, 16, 8], strides = [1, 1, 1]} : vector<10x18x8xbf16> to vector<8x16x8xbf16>
    %38 = vector.extract_strided_slice %33 {offsets = [1, 1, 0], sizes = [8, 16, 8], strides = [1, 1, 1]} : vector<10x18x8xbf16> to vector<8x16x8xbf16>
    %39 = vector.extract_strided_slice %33 {offsets = [1, 2, 0], sizes = [8, 16, 8], strides = [1, 1, 1]} : vector<10x18x8xbf16> to vector<8x16x8xbf16>
    %40 = vector.extract_strided_slice %33 {offsets = [2, 0, 0], sizes = [8, 16, 8], strides = [1, 1, 1]} : vector<10x18x8xbf16> to vector<8x16x8xbf16>
    %41 = vector.extract_strided_slice %33 {offsets = [2, 1, 0], sizes = [8, 16, 8], strides = [1, 1, 1]} : vector<10x18x8xbf16> to vector<8x16x8xbf16>
    %42 = vector.extract_strided_slice %33 {offsets = [2, 2, 0], sizes = [8, 16, 8], strides = [1, 1, 1]} : vector<10x18x8xbf16> to vector<8x16x8xbf16>
    %43 = tpu.concatenate %34, %35, %36, %37, %38, %39, %40, %41, %42 in 2 : vector<8x16x8xbf16>, vector<8x16x8xbf16>, vector<8x16x8xbf16>, vector<8x16x8xbf16>, vector<8x16x8xbf16>, vector<8x16x8xbf16>, vector<8x16x8xbf16>, vector<8x16x8xbf16>, vector<8x16x8xbf16> -> vector<8x16x72xbf16>
    %44 = vector.shape_cast %43 : vector<8x16x72xbf16> to vector<128x72xbf16>
    %c0_12 = arith.constant 0 : index
    %c0_13 = arith.constant 0 : index
    %45 = vector.load %arg5[%c0_12, %c0_13] : memref<72x8xbf16, #tpu.memory_space<vmem>>, vector<72x8xbf16>
    %cst_14 = arith.constant dense<0.000000e+00> : vector<128x8xf32>
    %46 = tpu.matmul %44, %45, %cst_14 {dimension_numbers = #tpu.dot_dimension_numbers<[1], [0], [0], [1], [0, 0, 1, 1], [], []>} : vector<128x72xbf16>, vector<72x8xbf16>, vector<128x8xf32> -> vector<128x8xf32>
    %c0_15 = arith.constant 0 : index
    %c0_16 = arith.constant 0 : index
    %47 = vector.load %arg6[%c0_15, %c0_16] : memref<1x8xf32, #tpu.memory_space<vmem>>, vector<1x8xf32>
    %48 = vector.broadcast %47 : vector<1x8xf32> to vector<128x8xf32>
    %49 = arith.addf %46, %48 : vector<128x8xf32>
    %cst_17 = arith.constant 0.000000e+00 : f32
    %50 = vector.broadcast %cst_17 : f32 to vector<128x8xf32>
    %51 = arith.maximumf %49, %50 : vector<128x8xf32>
    %52 = tpu.transpose %51, [1, 0] : vector<128x8xf32> -> vector<8x128xf32>
    %c0_18 = arith.constant 0 : index
    %c0_19 = arith.constant 0 : index
    %c0_20 = arith.constant 0 : index
    %53 = vector.load %arg7[%c0_18, %c0_19, %c0_20] : memref<1x8x128xf32, #tpu.memory_space<vmem>>, vector<1x8x128xf32>
    %54 = vector.shape_cast %53 : vector<1x8x128xf32> to vector<8x128xf32>
    %55 = vector.shape_cast %52 : vector<8x128xf32> to vector<1x8x128xf32>
    tpu.vector_store %arg7[%c0_18, %c0_19, %c0_20], %55 {strides = array<i32>} : memref<1x8x128xf32, #tpu.memory_space<vmem>>, vector<1x8x128xf32>,
    return
  }
  func.func @transform_0(%arg0: i32, %arg1: i32) -> (i32, i32, i32, i32, i32) {
    %c0_i32 = arith.constant 0 : i32
    %c0_i32_0 = arith.constant 0 : i32
    %c0_i32_1 = arith.constant 0 : i32
    %c0_i32_2 = arith.constant 0 : i32
    return %arg0, %arg1, %c0_i32, %c0_i32_0, %c0_i32_1 : i32, i32, i32, i32, i32
  }
  func.func @transform_1(%arg0: i32, %arg1: i32) -> (i32, i32) {
    %c0_i32 = arith.constant 0 : i32
    %c0_i32_0 = arith.constant 0 : i32
    %c0_i32_1 = arith.constant 0 : i32
    return %c0_i32, %c0_i32_0 : i32, i32
  }
  func.func @transform_2(%arg0: i32, %arg1: i32) -> (i32, i32) {
    %c0_i32 = arith.constant 0 : i32
    %c0_i32_0 = arith.constant 0 : i32
    %c0_i32_1 = arith.constant 0 : i32
    return %c0_i32, %c0_i32_0 : i32, i32
  }
  func.func @transform_3(%arg0: i32, %arg1: i32) -> (i32, i32) {
    %c0_i32 = arith.constant 0 : i32
    %c0_i32_0 = arith.constant 0 : i32
    %c0_i32_1 = arith.constant 0 : i32
    return %c0_i32, %c0_i32_0 : i32, i32
  }
  func.func @transform_4(%arg0: i32, %arg1: i32) -> (i32, i32) {
    %c0_i32 = arith.constant 0 : i32
    %c0_i32_0 = arith.constant 0 : i32
    %c0_i32_1 = arith.constant 0 : i32
    return %c0_i32, %c0_i32_0 : i32, i32
  }
  func.func @transform_5(%arg0: i32, %arg1: i32) -> (i32, i32, i32) {
    %c0_i32 = arith.constant 0 : i32
    %c0_i32_0 = arith.constant 0 : i32
    return %arg0, %c0_i32, %arg1 : i32, i32, i32
  }
}

</mosaic_0001>

<bundles_post_ra>
// kernel: double_conv.1
= control target key start
LH: loop header
LB: loop body
LE: loop exit
PB: predicated region body
PF: predicated region fallthrough
CT: control target
= control target key end

     0   :  { %s2261_s18 = smov 0   ;;  %s2263_s19 = smov 0   ;;  %s2956_s0 = inlined_call_operand.vmem [shape: bf16[2,2,12,18,4], index: 0, kind: input, shape index: {}]   ;;  %s2957_s1 = inlined_call_operand.vmem [shape: bf16[36,8], index: 1, kind: input, shape index: {}]   ;;  %s2958_s2 = inlined_call_operand.vmem [shape: f32[1,8], index: 2, kind: input, shape index: {}]   ;;  %s2959_s3 = inlined_call_operand.vmem [shape: bf16[72,8], index: 3, kind: input, shape index: {}]   ;;  %s2960_s4 = inlined_call_operand.vmem [shape: f32[1,8], index: 4, kind: input, shape index: {}]   ;;  %s2961_s5 = inlined_call_operand.vmem [shape: f32[2,8,256], index: 5, kind: output, shape index: {}]  }
   0x1   :  { %s2265_s20 = smov 0   ;;  %s2267_s21 = smov 0  }
   0x2   :  { %s2269_s22 = smov 0  }
   0x3 LB: > { %s24_s23 = sadd.s32 1, %s2209_s20  ;;  %s27_s24 = sadd.s32 1, %s2213_s21  ;;  %s2217_s22 = sphi %s2269_s22, %s15_s22   ;;  %s2213_s21 = sphi %s2267_s21, %s2967_s21   ;;  %s2209_s20 = sphi %s2265_s20, %s2966_s20   ;;  %s2205_s19 = sphi %s2263_s19, %s2965_s19   ;;  %s2201_s18 = sphi %s2261_s18, %s2964_s18  }
   0x4   : > { %p25_p0 = scmp.ge.s32.totalorder %s24_s23, 2  ;;  %p1955_p1 = scmp.ge.s32.totalorder %s2217_s22, 1 }
   0x5   : > { %p207_p2 = scmp.lt.s32.totalorder %s2217_s22, 5 }
   0x6   : > { %s2969_s23 = smov (%p25_p0, %s24_s23), 0  ;;  %s2971_s24 = smov (!%p25_p0, %s27_s24), %s2213_s21 }
   0x7   : > { %p208_p3 = pnand %p1955_p1, %p207_p2  ;;  %p29_p4 = scmp.ge.s32.totalorder %s2971_s24, 2 }
   0x8   : > { %p242_p5 = scmp.lt.s32.totalorder (!%p208_p3), %s2205_s19, 1  ;;  %p244_p6 = scmp.lt.s32.totalorder (!%p208_p3), %s2201_s18, 1 }
   0x9   : > { %s2973_s24 = smov (%p29_p4, %s2971_s24), 0  ;;  %211 = sbr.rel (%p208_p3) target bundleno = 930 (0x3a2), region = 40 }
   0xa   : > { %s2219_s8 = smov (!%p208_p3), 12   ;;  %s2220_s9 = smov (!%p208_p3), 20  }
   0xb   : > { %s2221_s10 = smov (!%p208_p3), 8   ;;  %s2222_s11 = smov (!%p208_p3), 4  }
   0xc   : > { %s2223_s12 = smov (!%p208_p3), 16   ;;  %s2224_s13 = smov (!%p208_p3), 24  }
   0xd   : > { %s2225_s14 = smov (!%p208_p3), 28   ;;  %p1087_p7 = scmp.gt.s32.totalorder (!%p208_p3), %s2201_s18, 0 }
   0xe   : > { %s2975_s19 = smov (!%p242_p5, %s2205_s19), 1  ;;  %vm517_vm0 = vcmask 1046528   ;;  %vm376_vm1 = vsmask.f32 7424  ;;  %v2169_v49 = vld [vmem:[%s2957_s1 + $0x8] sm:$0xff]   ;;  %vm950_vm2 = vcmask 1041408  }
   0xf   : > { %s2299_s25 = scalar_select %p244_p6, %s2201_s18, 1  ;;  %v2167_v45 = vld [vmem:[%s2957_s1 + $0x10] ss:$0 sps:$4 sm:$0x33]   ;;  %v2171_v54 = vld [vmem:[%s2957_s1] sm:$0xff]   ;;  %vm734_vm3 = vcmask 31744  }
  0x10   : > { %s2094_s26 = smul.u32 72, %s2975_s19  ;;  %2091 = vmatprep.subr.msk.bf16.mxu0 %vm950_vm2, %v2167_v45  ;;  %v952_v50 = vsel %vm950_vm2, %v2167_v45, 0  ;;  %vm755_vm4 = vcmask 64512   ;;  %vm776_vm5 = vcmask 97280   ;;  %vm797_vm6 = vcmask 130048   ;;  %s2229_s17 = smov 64  }
  0x11   : > { %s2093_s27 = smul.u32 36, %s2299_s25  ;;  %2040 = vmatpush3.bf16.msra.mxu0 %v952_v50  ;;  %vm818_vm7 = vcmask 162816   ;;  %vm839_vm8 = vcmask 195584   ;;  %vm860_vm9 = vcmask 228352   ;;  %vm881_vm10 = vcmask 261120  }
  0x12   : > { %2041 = vmatprep.subr.bf16.mxu0 %v2169_v49  ;;  %vm929_vm11 = vcmask 293888   ;;  %vm1199_vm13 = vcmask 1040384   ;;  %vm1200_vm14 = vsmask.f32 256  ;;  %vm1712_vm2 = vcmask 1043456  }
  0x13   : > { %s248_s28 = sadd.s32 %s2094_s26, %s2093_s27  ;;  %s2226_s27 = smov 32   ;;  %vm2629_vm15 = vmand %vm1199_vm13, %vm1200_vm14 }
  0x14   : > { %s1956_s29 = sshll.u32 %s248_s28, 2 }
  0x15   : > { %s2306_s7 = scalar_lea.vmem %s2956_s0, %s1956_s29  ;;  %2042 = vmatpush3.bf16.msra.mxu0 %v2169_v49  ;;  %s2230_s29 = smov 56  }
  0x16   : > { %v2309_v0 = vld [vmem:[%s2306_s7 + $0x18] sm:$0xff]   ;;  %v2312_v1 = vld [vmem:[%s2306_s7 + $0xc] sm:$0xff]   ;;  %v2149_v2 = vld [vmem:[%s2306_s7 + $0x14] ss:$0 sps:$4 sm:$0x11]   ;;  %2043 = vmatprep.subr.bf16.mxu0 %v2171_v54 }
  0x17   : > { %575 = vrot.lane.b32.xlu1 %v2309_v0, %s2219_s8  ;;  %v2318_v3 = vld [vmem:[%s2306_s7] sm:$0xff]   ;;  %573 = vrot.lane.b32.xlu0 %v2312_v1, %s2219_s8  ;;  %v521_v4 = vrot.slane %v2312_v1, 1  ;;  %v522_v5 = vrot.slane %v2149_v2, 1  ;;  %v2151_v6 = vld [vmem:[%s2306_s7 + $0x8] ss:$0 sps:$4 sm:$0x11]  }
  0x18   : > { %v518_v7 = vrot.slane %v2318_v3, 1  ;;  %v378_v8 = vshrl.u32 %v2318_v3, 16  ;;  %v380_v9 = vshll.u32 %v2318_v3, 16  ;;  %v390_v10 = vshrl.u32 %v2312_v1, 16  ;;  %v2338_v30 = vld [vmem:[%s2306_s7 + $0x24] sm:$0xff]   ;;  %v2365_v48 = vld [vmem:[%s2306_s7 + $0x30] sm:$0xff]  }
  0x19   : > { %v523_v11 = vsel %vm517_vm0, %v521_v4, %v522_v5  ;;  %v519_v12 = vrot.slane %v2151_v6, 1  ;;  %v385_v13 = vshll.u32 %v2151_v6, 16  ;;  %v2152_v14 = vld [vmem:[%s2306_s7 + $0x20] ss:$0 sps:$4 sm:$0x11]   ;;  %v392_v15 = vshll.u32 %v2312_v1, 16  ;;  %2044 = vmatpush3.bf16.msra.mxu0 %v2171_v54 }
  0x1a   : > { %v382_v16 = vrot.slane %v380_v9, 1  ;;  %v397_v17 = vshll.u32 %v2149_v2, 16  ;;  %v404_v18 = vshll.u32 %v2309_v0, 16  ;;  %v524_v23 = vrot.slane %v2309_v0, 1  ;;  %v2384_v60 = vld [vmem:[%s2306_s7 + $0x3c] sm:$0xff]   ;;  %v2460_v49 = vld [vmem:[%s2306_s7 + $0x6c] sm:$0xff]  }
  0x1b   : > { %631 = vrot.lane.b32.xlu0 %v523_v11, %s2220_s9  ;;  %v520_v19 = vsel %vm517_vm0, %v518_v7, %v519_v12  ;;  %v387_v20 = vrot.slane %v385_v13, 1  ;;  %v394_v21 = vrot.slane %v392_v15, 1  ;;  %v402_v25 = vshrl.u32 %v2309_v0, 16  ;;  %v2154_v33 = vld [vmem:[%s2306_s7 + $0x2c] ss:$0 sps:$4 sm:$0x11]  }
  0x1c   : > { %548 = vrot.lane.b32.xlu1 %v520_v19, %s2221_s10  ;;  %v383_v22 = vor.u32 %v382_v16, %v378_v8  ;;  %v399_v24 = vrot.slane %v397_v17, 1  ;;  %v525_v26 = vrot.slane %v2152_v14, 1  ;;  %v406_v28 = vrot.slane %v404_v18, 1  ;;  %v2156_v52 = vld [vmem:[%s2306_s7 + $0x38] ss:$0 sps:$4 sm:$0x11]  }
  0x1d   : > { %v395_v27 = vor.u32 %v394_v21, %v390_v10  ;;  %v409_v29 = vshll.u32 %v2152_v14, 16  ;;  %v416_v37 = vshll.u32 %v2338_v30, 16  ;;  %v414_v39 = vshrl.u32 %v2338_v30, 16  ;;  %v2158_v2 = vld [vmem:[%s2306_s7 + $0x44] ss:$0 sps:$4 sm:$0x11]  }
  0x1e   : > { %v388_v31 = vsel %vm376_vm1, %v383_v22, %v387_v20  ;;  %v526_v34 = vsel %vm517_vm0, %v524_v23, %v525_v26  ;;  %v407_v35 = vor.u32 %v406_v28, %v402_v25  ;;  %v421_v41 = vshll.u32 %v2154_v33, 16  ;;  %v2409_v14 = vld [vmem:[%s2306_s7 + $0x48] sm:$0xff]   ;;  %v2160_v16 = vld [vmem:[%s2306_s7 + $0x50] ss:$0 sps:$4 sm:$0x11]   ;;  %v2422_v23 = vld [vmem:[%s2306_s7 + $0x54] sm:$0xff]  }
  0x1f   : > { %497 = vrot.lane.b32.xlu0 %v388_v31, %s2222_s11  ;;  %v400_v32 = vsel %vm376_vm1, %v395_v27, %v399_v24  ;;  %v411_v36 = vrot.slane %v409_v29, 1  ;;  %v418_v40 = vrot.slane %v416_v37, 1  ;;  %v527_v46 = vrot.slane %v2338_v30, 1  ;;  %v2162_v27 = vld [vmem:[%s2306_s7 + $0x5c] ss:$0 sps:$4 sm:$0x11]  }
  0x20   : > { %550 = vrot.lane.b32.xlu1 %v523_v11, %s2221_s10  ;;  %v423_v43 = vrot.slane %v421_v41, 1  ;;  %v528_v47 = vrot.slane %v2154_v33, 1  ;;  %v428_v53 = vshll.u32 %v2365_v48, 16  ;;  %v426_v55 = vshrl.u32 %v2365_v48, 16 }
  0x21   : > { %v412_v38 = vsel %vm376_vm1, %v407_v35, %v411_v36  ;;  %v419_v42 = vor.u32 %v418_v40, %v414_v39  ;;  %v433_v57 = vshll.u32 %v2156_v52, 16  ;;  %v530_v62 = vrot.slane %v2365_v48, 1  ;;  %v2447_v39 = vld [vmem:[%s2306_s7 + $0x60] sm:$0xff]   ;;  %v2164_v41 = vld [vmem:[%s2306_s7 + $0x68] ss:$0 sps:$4 sm:$0x11]  }
  0x22   : > { %v529_v51 = vsel %vm517_vm0, %v527_v46, %v528_v47  ;;  %v430_v56 = vrot.slane %v428_v53, 1  ;;  %v531_v63 = vrot.slane %v2156_v52, 1  ;;  %v440_v4 = vshll.u32 %v2384_v60, 16  ;;  %v2166_v53 = vld [vmem:[%s2306_s7 + $0x74] ss:$0 sps:$4 sm:$0x11]  }
  0x23   : > { %499 = vrot.lane.b32.xlu0 %v400_v32, %s2222_s11  ;;  %v424_v44 = vsel %vm376_vm1, %v419_v42, %v423_v43  ;;  %v435_v59 = vrot.slane %v433_v57, 1  ;;  %v438_v6 = vshrl.u32 %v2384_v60, 16  ;;  %v445_v8 = vshll.u32 %v2158_v2, 16 }
  0x24   : > { %633 = vrot.lane.b32.xlu1 %v526_v34, %s2220_s9  ;;  %v431_v58 = vor.u32 %v430_v56, %v426_v55  ;;  %v532_v5 = vsel %vm517_vm0, %v530_v62, %v531_v63  ;;  %v442_v7 = vrot.slane %v440_v4, 1  ;;  %v533_v12 = vrot.slane %v2384_v60, 1 }
  0x25   : > { %v447_v10 = vrot.slane %v445_v8, 1  ;;  %v534_v13 = vrot.slane %v2158_v2, 1  ;;  %v452_v17 = vshll.u32 %v2409_v14, 16  ;;  %v450_v18 = vshrl.u32 %v2409_v14, 16 }
  0x26   : > { %v436_v61 = vsel %vm376_vm1, %v431_v58, %v435_v59  ;;  %v443_v9 = vor.u32 %v442_v7, %v438_v6  ;;  %v457_v20 = vshll.u32 %v2160_v16, 16  ;;  %v536_v25 = vrot.slane %v2409_v14, 1 }
  0x27   : > { %608 = vrot.lane.b32.xlu0 %v400_v32, %s2223_s12  ;;  %v535_v15 = vsel %vm517_vm0, %v533_v12, %v534_v13  ;;  %v454_v19 = vrot.slane %v452_v17, 1  ;;  %v537_v26 = vrot.slane %v2160_v16, 1  ;;  %v464_v28 = vshll.u32 %v2422_v23, 16  ;;  %v2170_v13 = vld [vmem:[%s2306_s7 + $0x80] ss:$0 sps:$4 sm:$0x11]  }
  0x28   : > { %610 = vrot.lane.b32.xlu1 %v412_v38, %s2223_s12  ;;  %v448_v11 = vsel %vm376_vm1, %v443_v9, %v447_v10  ;;  %v459_v22 = vrot.slane %v457_v20, 1  ;;  %v462_v31 = vshrl.u32 %v2422_v23, 16  ;;  %v469_v33 = vshll.u32 %v2162_v27, 16  ;;  %v2485_v9 = vld [vmem:[%s2306_s7 + $0x78] sm:$0xff]  }
  0x29   : > { %v455_v21 = vor.u32 %v454_v19, %v450_v18  ;;  %v538_v29 = vsel %vm517_vm0, %v536_v25, %v537_v26  ;;  %v466_v32 = vrot.slane %v464_v28, 1  ;;  %v539_v37 = vrot.slane %v2422_v23, 1  ;;  %v2172_v28 = vld [vmem:[%s2306_s7 + $0x84] sm:$0xff]  }
  0x2a   : > { %v471_v35 = vrot.slane %v469_v33, 1  ;;  %v476_v42 = vshll.u32 %v2447_v39, 16  ;;  %v474_v43 = vshrl.u32 %v2447_v39, 16  ;;  %v481_v45 = vshll.u32 %v2164_v41, 16 }
  0x2b   : > { %656 = vrot.lane.b32.xlu0 %v2309_v0, %s2224_s13  ;;  %v460_v24 = vsel %vm376_vm1, %v455_v21, %v459_v22  ;;  %v543_v52 = vrot.slane %v2164_v41, 1  ;;  %v488_v54 = vshll.u32 %v2460_v49, 16  ;;  %v486_v56 = vshrl.u32 %v2460_v49, 16 }
  0x2c   : > { %658 = vrot.lane.b32.xlu1 %v2338_v30, %s2224_s13  ;;  %v483_v47 = vrot.slane %v481_v45, 1  ;;  %v493_v58 = vshll.u32 %v2166_v53, 16  ;;  %v545_v6 = vrot.slane %v2460_v49, 1  ;;  %v546_v7 = vrot.slane %v2166_v53, 1 }
  0x2d   : > { %v490_v57 = vrot.slane %v488_v54, 1  ;;  %v597_v19 = vshrl.u32 %v2485_v9, 16  ;;  %v604_v21 = vshll.u32 %v2170_v13, 16  ;;  %v628_v33 = vrot.slane %v2485_v9, 1 }
  0x2e   : > { %v495_v63 = vrot.slane %v493_v58, 1  ;;  %v680_v45 = vshrl.u32 %v2172_v28, 16 }
  0x2f   : > { %691 = vrot.lane.b32.xlu0 %v412_v38, %s2225_s14  ;;  %v491_v62 = vor.u32 %v490_v57, %v486_v56 }
  0x30   : > { %693 = vrot.lane.b32.xlu1 %v424_v44, %s2225_s14 }
  0x31   : > { %v496_v4 = vsel %vm376_vm1, %v491_v62, %v495_v63 }
  0x33   : > { %714 = vrot.lane.b32.xlu0 %v526_v34, %s2226_s27 }
  0x34   : > { %501 = vrot.lane.b32.xlu1 %v412_v38, %s2222_s11  ;;  %v540_v38 = vrot.slane %v2162_v27, 1 }
  0x36   : > { %v541_v40 = vsel %vm517_vm0, %v539_v37, %v540_v38  ;;  %v629_v37 = vrot.slane %v2170_v13, 1  ;;  %v2173_v38 = vld [vmem:[%s2306_s7 + $0x8c] ss:$0 sps:$4 sm:$0x11]   ;;  %s1088_s7 = scalar_select %p1087_p7, 1, 0 }
  0x37   : > { %716 = vrot.lane.b32.xlu0 %v529_v51, %s2226_s27 }
  0x38   : > { %503 = vrot.lane.b32.xlu1 %v424_v44, %s2222_s11 }
  0x3b   : > { %552 = vrot.lane.b32.xlu0 %v526_v34, %s2221_s10  ;;  %v467_v34 = vor.u32 %v466_v32, %v462_v31 }
  0x3c   : > { %554 = vrot.lane.b32.xlu1 %v529_v51, %s2221_s10 }
  0x3d   : > { %v472_v36 = vsel %vm376_vm1, %v467_v34, %v471_v35 }
  0x3f   : > { %577 = vrot.lane.b32.xlu0 %v2338_v30, %s2219_s8 }
  0x40   : > { %579 = vrot.lane.b32.xlu1 %v2365_v48, %s2219_s8 }
  0x43   : > { %612 = vrot.lane.b32.xlu0 %v424_v44, %s2223_s12  ;;  %v478_v44 = vrot.slane %v476_v42, 1 }
  0x44   : > { %614 = vrot.lane.b32.xlu1 %v436_v61, %s2223_s12 }
  0x45   : > { %v479_v46 = vor.u32 %v478_v44, %v474_v43 }
  0x47   : > { %635 = vrot.lane.b32.xlu0 %v529_v51, %s2220_s9  ;;  %v484_v50 = vsel %vm376_vm1, %v479_v46, %v483_v47  ;;  %v542_v51 = vrot.slane %v2447_v39, 1 }
  0x48   : > { %637 = vrot.lane.b32.xlu1 %v532_v5, %s2220_s9 }
  0x49   : > { %v544_v55 = vsel %vm517_vm0, %v542_v51, %v543_v52  ;;  %v687_v52 = vshll.u32 %v2173_v38, 16 }
  0x4b   : > { %660 = vrot.lane.b32.xlu0 %v2365_v48, %s2224_s13 }
  0x4c   : > { %662 = vrot.lane.b32.xlu1 %v2384_v60, %s2224_s13 }
  0x4f   : > { %695 = vrot.lane.b32.xlu0 %v436_v61, %s2225_s14 }
  0x50   : > { %697 = vrot.lane.b32.xlu1 %v448_v11, %s2225_s14 }
  0x53   : > { %718 = vrot.lane.b32.xlu0 %v532_v5, %s2226_s27 }
  0x54   : > { %505 = vrot.lane.b32.xlu1 %v436_v61, %s2222_s11 }
  0x57   : > { %720 = vrot.lane.b32.xlu0 %v535_v15, %s2226_s27 }
  0x58   : > { %507 = vrot.lane.b32.xlu1 %v448_v11, %s2222_s11 }
  0x5b   : > { %556 = vrot.lane.b32.xlu0 %v532_v5, %s2221_s10 }
  0x5c   : > { %558 = vrot.lane.b32.xlu1 %v535_v15, %s2221_s10 }
  0x5f   : > { %581 = vrot.lane.b32.xlu0 %v2384_v60, %s2219_s8 }
  0x60   : > { %583 = vrot.lane.b32.xlu1 %v2409_v14, %s2219_s8 }
  0x63   : > { %616 = vrot.lane.b32.xlu0 %v448_v11, %s2223_s12  ;;  %v547_v11 = vsel %vm517_vm0, %v545_v6, %v546_v7  ;;  %v712_v6 = vrot.slane %v2173_v38, 1 }
  0x64   : > { %618 = vrot.lane.b32.xlu1 %v460_v24, %s2223_s12 }
  0x67   : > { %639 = vrot.lane.b32.xlu0 %v535_v15, %s2220_s9  ;;  %v599_v15 = vshll.u32 %v2485_v9, 16 }
  0x68   : > { %641 = vrot.lane.b32.xlu1 %v538_v29, %s2220_s9 }
  0x69   : > { %v601_v20 = vrot.slane %v599_v15, 1 }
  0x6b   : > { %664 = vrot.lane.b32.xlu0 %v2409_v14, %s2224_s13  ;;  %v602_v27 = vor.u32 %v601_v20, %v597_v19 }
  0x6c   : > { %666 = vrot.lane.b32.xlu1 %v2422_v23, %s2224_s13 }
  0x6f   : > { %699 = vrot.lane.b32.xlu0 %v460_v24, %s2225_s14 }
  0x70   : > { %701 = vrot.lane.b32.xlu1 %v472_v36, %s2225_s14 }
  0x73   : > { %722 = vrot.lane.b32.xlu0 %v538_v29, %s2226_s27 }
  0x74   : > { %509 = vrot.lane.b32.xlu1 %v460_v24, %s2222_s11 }
  0x77   : > { %724 = vrot.lane.b32.xlu0 %v541_v40, %s2226_s27 }
  0x78   : > { %511 = vrot.lane.b32.xlu1 %v472_v36, %s2222_s11 }
  0x7b   : > { %560 = vrot.lane.b32.xlu0 %v538_v29, %s2221_s10 }
  0x7c   : > { %562 = vrot.lane.b32.xlu1 %v541_v40, %s2221_s10 }
  0x7f   : > { %585 = vrot.lane.b32.xlu0 %v2422_v23, %s2219_s8 }
  0x80   : > { %587 = vrot.lane.b32.xlu1 %v2447_v39, %s2219_s8 }
  0x83   : > { %620 = vrot.lane.b32.xlu0 %v472_v36, %s2223_s12 }
  0x84   : > { %622 = vrot.lane.b32.xlu1 %v484_v50, %s2223_s12 }
  0x87   : > { %643 = vrot.lane.b32.xlu0 %v541_v40, %s2220_s9  ;;  %v682_v40 = vshll.u32 %v2172_v28, 16 }
  0x88   : > { %645 = vrot.lane.b32.xlu1 %v544_v55, %s2220_s9 }
  0x89   : > { %v576_v59 = vpop.permute.xlu1 %575  ;;  %v574_v61 = vpop.permute.xlu0 %573  ;;  %v684_v51 = vrot.slane %v682_v40, 1 }
  0x8b   : > { %668 = vrot.lane.b32.xlu0 %v2447_v39, %s2224_s13 }
  0x8c   : > { %670 = vrot.lane.b32.xlu1 %v2460_v49, %s2224_s13 }
  0x8d   : > { %v632_v2 = vpop.permute.xlu0 %631 }
  0x8e   : > { %v549_v5 = vpop.permute.xlu1 %548 }
  0x8f   : > { %703 = vrot.lane.b32.xlu0 %v484_v50, %s2225_s14 }
  0x90   : > { %705 = vrot.lane.b32.xlu1 %v496_v4, %s2225_s14 }
  0x91   : > { %v498_v8 = vpop.permute.xlu0 %497 }
  0x92   : > { %v551_v10 = vpop.permute.xlu1 %550  ;;  %v736_v17 = vsel %vm734_vm3, %v2318_v3, %v498_v8  ;;  %v606_v3 = vrot.slane %v604_v21, 1 }
  0x93   : > { %726 = vrot.lane.b32.xlu0 %v544_v55, %s2226_s27  ;;  %v757_v25 = vsel %vm755_vm4, %v736_v17, %v549_v5  ;;  %v711_v5 = vrot.slane %v2172_v28, 1 }
  0x94   : > { %513 = vrot.lane.b32.xlu1 %v484_v50, %s2222_s11  ;;  %v778_v32 = vsel %vm776_vm5, %v757_v25, %v574_v61  ;;  %v607_v36 = vsel %vm376_vm1, %v602_v27, %v606_v3  ;;  %v630_v50 = vsel %vm517_vm0, %v628_v33, %v629_v37  ;;  %v689_v61 = vrot.slane %v687_v52, 1 }
  0x95   : > { %v500_v12 = vpop.permute.xlu0 %499 }
  0x96   : > { %v634_v16 = vpop.permute.xlu1 %633  ;;  %v738_v24 = vsel %vm734_vm3, %v2312_v1, %v500_v12 }
  0x97   : > { %728 = vrot.lane.b32.xlu0 %v547_v11, %s2226_s27  ;;  %v759_v29 = vsel %vm755_vm4, %v738_v24, %v551_v10  ;;  %v713_v10 = vsel %vm517_vm0, %v711_v5, %v712_v6 }
  0x98   : > { %515 = vrot.lane.b32.xlu1 %v496_v4, %s2222_s11  ;;  %v780_v34 = vsel %vm776_vm5, %v759_v29, %v576_v59  ;;  %v685_v59 = vor.u32 %v684_v51, %v680_v45 }
  0x99   : > { %v609_v18 = vpop.permute.xlu0 %608 }
  0x9a   : > { %v611_v22 = vpop.permute.xlu1 %610  ;;  %v799_v1 = vsel %vm797_vm6, %v778_v32, %v609_v18 }
  0x9b   : > { %564 = vrot.lane.b32.xlu0 %v544_v55, %s2221_s10  ;;  %v820_v42 = vsel %vm818_vm7, %v799_v1, %v632_v2  ;;  %v801_v43 = vsel %vm797_vm6, %v780_v34, %v611_v22 }
  0x9c   : > { %566 = vrot.lane.b32.xlu1 %v547_v11, %s2221_s10  ;;  %v822_v55 = vsel %vm818_vm7, %v801_v43, %v634_v16 }
  0x9d   : > { %v657_v26 = vpop.permute.xlu0 %656 }
  0x9e   : > { %v659_v31 = vpop.permute.xlu1 %658  ;;  %v841_v44 = vsel %vm839_vm8, %v820_v42, %v657_v26 }
  0x9f   : > { %589 = vrot.lane.b32.xlu0 %v2460_v49, %s2219_s8  ;;  %v843_v56 = vsel %vm839_vm8, %v822_v55, %v659_v31 }
  0xa0   : > { %591 = vrot.lane.b32.xlu1 %v2485_v9, %s2219_s8  ;;  %s2227_s8 = smov 40  }
  0xa1   : > { %v692_v35 = vpop.permute.xlu0 %691 }
  0xa2   : > { %v694_v41 = vpop.permute.xlu1 %693  ;;  %v862_v46 = vsel %vm860_vm9, %v841_v44, %v692_v35 }
  0xa3   : > { %624 = vrot.lane.b32.xlu0 %v496_v4, %s2223_s12  ;;  %v864_v57 = vsel %vm860_vm9, %v843_v56, %v694_v41  ;;  %v690_v4 = vsel %vm376_vm1, %v685_v59, %v689_v61 }
  0xa4   : > { %626 = vrot.lane.b32.xlu1 %v607_v36, %s2223_s12 }
  0xa5   : > { %v715_v47 = vpop.permute.xlu0 %714 }
  0xa6   : > { %v502_v53 = vpop.permute.xlu1 %501  ;;  %v883_v54 = vsel %vm881_vm10, %v862_v46, %v715_v47 }
  0xa7   : > { %647 = vrot.lane.b32.xlu0 %v547_v11, %s2220_s9  ;;  %2045 = vmatprep.mubr.msk.bf16.mxu0 %vm929_vm11, %v883_v54  ;;  %v740_v16 = vsel %vm734_vm3, %v2309_v0, %v502_v53 }
  0xa8   : > { %649 = vrot.lane.b32.xlu1 %v630_v50, %s2220_s9  ;;  %s2228_s9 = smov 48  }
  0xa9   : > { %v717_v58 = vpop.permute.xlu0 %716 }
  0xaa   : > { %v504_v62 = vpop.permute.xlu1 %503  ;;  %v885_v63 = vsel %vm881_vm10, %v864_v57, %v717_v58 }
  0xab   : > { %672 = vrot.lane.b32.xlu0 %v2485_v9, %s2224_s13  ;;  %2046 = vmatmul.mubr.msk.bf16.vlgmr.msra.gmra.mxu0 %vm929_vm11, %v885_v63  ;;  %v742_v19 = vsel %vm734_vm3, %v2338_v30, %v504_v62 }
  0xac   : > { %674 = vrot.lane.b32.xlu1 %v2172_v28, %s2224_s13 }
  0xad   : > { %v553_v2 = vpop.permute.xlu0 %552 }
  0xae   : > { %v555_v7 = vpop.permute.xlu1 %554  ;;  %v761_v20 = vsel %vm755_vm4, %v740_v16, %v553_v2 }
  0xaf   : > { %707 = vrot.lane.b32.xlu0 %v607_v36, %s2225_s14  ;;  %v763_v24 = vsel %vm755_vm4, %v742_v19, %v555_v7 }
  0xb0   : > { %709 = vrot.lane.b32.xlu1 %v690_v4, %s2225_s14  ;;  %s1094_s14 = scalar_select %p244_p6, 1, 0 }
  0xb1   : > { %v578_v8 = vpop.permute.xlu0 %577 }
  0xb2   : > { %v580_v11 = vpop.permute.xlu1 %579  ;;  %v782_v21 = vsel %vm776_vm5, %v761_v20, %v578_v8 }
  0xb3   : > { %730 = vrot.lane.b32.xlu0 %v630_v50, %s2226_s27  ;;  %v784_v0 = vsel %vm776_vm5, %v763_v24, %v580_v11 }
  0xb4   : > { %732 = vrot.lane.b32.xlu1 %v713_v10, %s2226_s27 }
  0xb5   : > { %v613_v9 = vpop.permute.xlu0 %612 }
  0xb6   : > { %v615_v12 = vpop.permute.xlu1 %614  ;;  %v803_v25 = vsel %vm797_vm6, %v782_v21, %v613_v9 }
  0xb7   : > { %v805_v30 = vsel %vm797_vm6, %v784_v0, %v615_v12 }
  0xb9   : > { %v636_v13 = vpop.permute.xlu0 %635 }
  0xba   : > { %v638_v15 = vpop.permute.xlu1 %637  ;;  %v824_v27 = vsel %vm818_vm7, %v803_v25, %v636_v13 }
  0xbb   : > { %v826_v1 = vsel %vm818_vm7, %v805_v30, %v638_v15 }
  0xbd   : > { %v661_v17 = vpop.permute.xlu0 %660 }
  0xbe   : > { %v663_v18 = vpop.permute.xlu1 %662  ;;  %v845_v3 = vsel %vm839_vm8, %v824_v27, %v661_v17 }
  0xbf   : > { %v847_v33 = vsel %vm839_vm8, %v826_v1, %v663_v18 }
  0xc1   : > { %v696_v22 = vpop.permute.xlu0 %695 }
  0xc2   : > { %v698_v26 = vpop.permute.xlu1 %697  ;;  %v866_v28 = vsel %vm860_vm9, %v845_v3, %v696_v22 }
  0xc3   : > { %v868_v34 = vsel %vm860_vm9, %v847_v33, %v698_v26 }
  0xc5   : > { %v719_v29 = vpop.permute.xlu0 %718 }
  0xc6   : > { %v506_v31 = vpop.permute.xlu1 %505  ;;  %v887_v32 = vsel %vm881_vm10, %v866_v28, %v719_v29 }
  0xc7   : > { %2049 = vmatprep.mubr.msk.bf16.mxu0 %vm929_vm11, %v887_v32  ;;  %v744_v47 = vsel %vm734_vm3, %v2365_v48, %v506_v31 }
  0xc9   : > { %v721_v35 = vpop.permute.xlu0 %720 }
  0xca   : > { %v508_v36 = vpop.permute.xlu1 %507  ;;  %v889_v37 = vsel %vm881_vm10, %v868_v34, %v721_v35 }
  0xcb   : > { %2050 = vmatmul.mubr.msk.bf16.gmra.mxu0 %vm929_vm11, %v889_v37  ;;  %v746_v52 = vsel %vm734_vm3, %v2384_v60, %v508_v36 }
  0xcd   : > { %v557_v38 = vpop.permute.xlu0 %556 }
  0xce   : > { %v559_v40 = vpop.permute.xlu1 %558  ;;  %v765_v53 = vsel %vm755_vm4, %v744_v47, %v557_v38 }
  0xcf   : > { %v767_v56 = vsel %vm755_vm4, %v746_v52, %v559_v40 }
  0xd1   : > { %v582_v41 = vpop.permute.xlu0 %581 }
  0xd2   : > { %v584_v42 = vpop.permute.xlu1 %583  ;;  %v786_v54 = vsel %vm776_vm5, %v765_v53, %v582_v41 }
  0xd3   : > { %v788_v48 = vsel %vm776_vm5, %v767_v56, %v584_v42 }
  0xd5   : > { %v617_v43 = vpop.permute.xlu0 %616 }
  0xd6   : > { %v619_v44 = vpop.permute.xlu1 %618  ;;  %v807_v57 = vsel %vm797_vm6, %v786_v54, %v617_v43 }
  0xd7   : > { %v809_v60 = vsel %vm797_vm6, %v788_v48, %v619_v44 }
  0xd9   : > { %v640_v45 = vpop.permute.xlu0 %639 }
  0xda   : > { %v642_v46 = vpop.permute.xlu1 %641  ;;  %v828_v59 = vsel %vm818_vm7, %v807_v57, %v640_v45 }
  0xdb   : > { %v830_v5 = vsel %vm818_vm7, %v809_v60, %v642_v46 }
  0xdd   : > { %v665_v50 = vpop.permute.xlu0 %664 }
  0xde   : > { %v667_v51 = vpop.permute.xlu1 %666  ;;  %v849_v61 = vsel %vm839_vm8, %v828_v59, %v665_v50 }
  0xdf   : > { %v851_v6 = vsel %vm839_vm8, %v830_v5, %v667_v51 }
  0xe1   : > { %v700_v55 = vpop.permute.xlu0 %699 }
  0xe2   : > { %v702_v58 = vpop.permute.xlu1 %701  ;;  %v870_v62 = vsel %vm860_vm9, %v849_v61, %v700_v55 }
  0xe3   : > { %v872_v7 = vsel %vm860_vm9, %v851_v6, %v702_v58 }
  0xe5   : > { %v723_v63 = vpop.permute.xlu0 %722 }
  0xe6   : > { %v510_v2 = vpop.permute.xlu1 %509  ;;  %v891_v4 = vsel %vm881_vm10, %v870_v62, %v723_v63 }
  0xe7   : > { %2053 = vmatprep.mubr.msk.bf16.mxu0 %vm929_vm11, %v891_v4  ;;  %v748_v20 = vsel %vm734_vm3, %v2409_v14, %v510_v2 }
  0xe9   : > { %v725_v8 = vpop.permute.xlu0 %724 }
  0xea   : > { %v512_v10 = vpop.permute.xlu1 %511  ;;  %v893_v11 = vsel %vm881_vm10, %v872_v7, %v725_v8 }
  0xeb   : > { %2054 = vmatmul.mubr.msk.bf16.gmra.mxu0 %vm929_vm11, %v893_v11  ;;  %v750_v24 = vsel %vm734_vm3, %v2422_v23, %v512_v10  ;;  %v2623_v11 = vld [vmem:[%s2958_s2] ss:$0 sm:$0xff] }
  0xed   : > { %v561_v9 = vpop.permute.xlu0 %560 }
  0xee   : > { %v563_v12 = vpop.permute.xlu1 %562  ;;  %v769_v25 = vsel %vm755_vm4, %v748_v20, %v561_v9 }
  0xef   : > { %v771_v3 = vsel %vm755_vm4, %v750_v24, %v563_v12 }
  0xf1   : > { %v586_v13 = vpop.permute.xlu0 %585 }
  0xf2   : > { %v588_v15 = vpop.permute.xlu1 %587  ;;  %v790_v26 = vsel %vm776_vm5, %v769_v25, %v586_v13 }
  0xf3   : > { %v792_v14 = vsel %vm776_vm5, %v771_v3, %v588_v15 }
  0xf5   : > { %v621_v16 = vpop.permute.xlu0 %620 }
  0xf6   : > { %v623_v17 = vpop.permute.xlu1 %622  ;;  %v811_v0 = vsel %vm797_vm6, %v790_v26, %v621_v16  ;;  %v1089_v16 = vstv %s1088_s7 }
  0xf7   : > { %v813_v23 = vsel %vm797_vm6, %v792_v14, %v623_v17  ;;  %vm1090_vm12 = vcmp.eq.s32.totalorder %v1089_v16, 1 }
  0xf9   : > { %v644_v18 = vpop.permute.xlu0 %643 }
  0xfa   : > { %v646_v19 = vpop.permute.xlu1 %645  ;;  %v832_v29 = vsel %vm818_vm7, %v811_v0, %v644_v18 }
  0xfb   : > { %v834_v34 = vsel %vm818_vm7, %v813_v23, %v646_v19 }
  0xfd   : > { %v669_v21 = vpop.permute.xlu0 %668 }
  0xfe   : > { %v671_v22 = vpop.permute.xlu1 %670  ;;  %v853_v30 = vsel %vm839_vm8, %v832_v29, %v669_v21 }
  0xff   : > { %v855_v35 = vsel %vm839_vm8, %v834_v34, %v671_v22 }
 0x101   : > { %v704_v27 = vpop.permute.xlu0 %703 }
 0x102   : > { %v706_v28 = vpop.permute.xlu1 %705  ;;  %v874_v31 = vsel %vm860_vm9, %v853_v30, %v704_v27 }
 0x103   : > { %v876_v36 = vsel %vm860_vm9, %v855_v35, %v706_v28 }
 0x105   : > { %v727_v32 = vpop.permute.xlu0 %726 }
 0x106   : > { %v514_v1 = vpop.permute.xlu1 %513  ;;  %v895_v33 = vsel %vm881_vm10, %v874_v31, %v727_v32 }
 0x107   : > { %2057 = vmatprep.mubr.msk.bf16.mxu0 %vm929_vm11, %v895_v33  ;;  %v752_v52 = vsel %vm734_vm3, %v2447_v39, %v514_v1 }
 0x109   : > { %v729_v37 = vpop.permute.xlu0 %728 }
 0x10a   : > { %v516_v38 = vpop.permute.xlu1 %515  ;;  %v897_v40 = vsel %vm881_vm10, %v876_v36, %v729_v37 }
 0x10b   : > { %2058 = vmatmul.mubr.msk.bf16.gmra.mxu0 %vm929_vm11, %v897_v40  ;;  %v754_v47 = vsel %vm734_vm3, %v2460_v49, %v516_v38 }
 0x10d   : > { %v565_v41 = vpop.permute.xlu0 %564 }
 0x10e   : > { %v567_v42 = vpop.permute.xlu1 %566  ;;  %v773_v55 = vsel %vm755_vm4, %v752_v52, %v565_v41 }
 0x10f   : > { %v775_v53 = vsel %vm755_vm4, %v754_v47, %v567_v42 }
 0x111   : > { %v590_v43 = vpop.permute.xlu0 %589 }
 0x112   : > { %v592_v44 = vpop.permute.xlu1 %591  ;;  %v794_v58 = vsel %vm776_vm5, %v773_v55, %v590_v43 }
 0x113   : > { %v796_v56 = vsel %vm776_vm5, %v775_v53, %v592_v44  ;;  %vm1618_vm5 = vcmask 457728  }
 0x115   : > { %v625_v45 = vpop.permute.xlu0 %624 }
 0x116   : > { %v627_v46 = vpop.permute.xlu1 %626  ;;  %v815_v49 = vsel %vm797_vm6, %v794_v58, %v625_v45 }
 0x117   : > { %v817_v59 = vsel %vm797_vm6, %v796_v56, %v627_v46 }
 0x119   : > { %v648_v50 = vpop.permute.xlu0 %647 }
 0x11a   : > { %v650_v51 = vpop.permute.xlu1 %649  ;;  %v836_v62 = vsel %vm818_vm7, %v815_v49, %v648_v50 }
 0x11b   : > { %v838_v39 = vsel %vm818_vm7, %v817_v59, %v650_v51  ;;  %vm1635_vm7 = vcmask 523264  }
 0x11d   : > { %v673_v54 = vpop.permute.xlu0 %672 }
 0x11e   : > { %v675_v57 = vpop.permute.xlu1 %674  ;;  %v857_v63 = vsel %vm839_vm8, %v836_v62, %v673_v54 }
 0x11f   : > { %v859_v60 = vsel %vm839_vm8, %v838_v39, %v675_v57 }
 0x121   : > { %v708_v61 = vpop.permute.xlu0 %707 }
 0x122   : > { %v710_v48 = vpop.permute.xlu1 %709  ;;  %v878_v2 = vsel %vm860_vm9, %v857_v63, %v708_v61 }
 0x123   : > { %v880_v5 = vsel %vm860_vm9, %v859_v60, %v710_v48  ;;  %vm1695_vm9 = vcmask 588800  }
 0x125   : > { %v731_v4 = vpop.permute.xlu0 %730 }
 0x126   : > { %v733_v6 = vpop.permute.xlu1 %732  ;;  %v899_v7 = vsel %vm881_vm10, %v878_v2, %v731_v4 }
 0x127   : > { %v901_v8 = vsel %vm881_vm10, %v880_v5, %v733_v6  ;;  %2061 = vmatprep.mubr.msk.bf16.mxu0 %vm929_vm11, %v899_v7 }
 0x128   : > { %2062 = vmatmul.mubr.msk.bf16.gmra.mxu0 %vm929_vm11, %v901_v8 }
 0x16b   : > { %v2047_v10 = vpop.f32.mrf.mxu0 }
 0x16c   : > { %v997_v12 = vadd.f32 %v2047_v10, %v2623_v11 }
 0x16d   : > { %v988_v9 = vpop.f32.mrf.mxu0 }
 0x16e   : > { %v989_v13 = vadd.f32 %v2623_v11, %v988_v9  ;;  %v1069_v19 = vmax.f32 %v997_v12, 0.0 }
 0x16f   : > { %v2048_v15 = vpop.f32.mrf.mxu0 }
 0x170   : > { %v1000_v17 = vadd.f32 %v2048_v15, %v2623_v11  ;;  %v1067_v20 = vmax.f32 %v989_v13, 0.0 }
 0x171   : > { %v991_v18 = vpop.f32.mrf.mxu0 }
 0x172   : > { %v1070_v21 = vmax.f32 %v1000_v17, 0.0  ;;  %v992_v22 = vadd.f32 %v2623_v11, %v991_v18  ;;  %v1091_v26 = vsel %vm1090_vm12, %v1067_v20, 0.0 }
 0x174   : > { %v1100_v24 = vpack.c.bf16 %v1070_v21, %v1069_v19  ;;  %v1068_v25 = vmax.f32 %v992_v22, 0.0 }
 0x176   : > { %v1117_v27 = vshrl.u32 %v1100_v24, 16  ;;  %v1092_v3 = vsel %vm1090_vm12, %v1068_v25, 0.0  ;;  %v1120_v30 = vshll.u32 %v1100_v24, 16 }
 0x177   : > { %v1099_v0 = vpack.c.bf16 %v1092_v3, %v1091_v26 }
 0x178   : > { %v1119_v29 = vrot.slane %v1117_v27, 7 }
 0x179   : > { %v1110_v14 = vshrl.u32 %v1099_v0, 16  ;;  %v1113_v1 = vshll.u32 %v1099_v0, 16 }
 0x17a   : > { %v1122_v31 = vor.u32 %v1120_v30, %v1119_v29  ;;  %v1213_v32 = vsel %vm2629_vm15, %v1119_v29, 0  ;;  %v2174_v30 = vld [vmem:[%s2959_s3 + $0x20] ss:$0 sps:$4 sm:$0xff]  }
 0x17b   : > { %v1112_v23 = vrot.slane %v1110_v14, 7  ;;  %v1354_v34 = vrot.slane %v1213_v32, 1  ;;  %v1242_v38 = vshll.u32 %v1213_v32, 16  ;;  %2092 = vmatprep.subr.msk.bf16.mxu1 %vm1712_vm2, %v2174_v30 }
 0x17c   : > { %v2637_v33 = vsel %vm2629_vm15, 0, %v1122_v31 }
 0x17d   : > { %v1115_v35 = vor.u32 %v1113_v1, %v1112_v23  ;;  %1391 = vrot.lane.b32.xlu0 %v2637_v33, %s2224_s13  ;;  %v1353_v36 = vrot.slane %v2637_v33, 1  ;;  %v1237_v37 = vshll.u32 %v2637_v33, 16  ;;  %v1235_v40 = vshrl.u32 %v2637_v33, 16  ;;  %v2175_v1 = vld [vmem:[%s2959_s3 + $0x18] sm:$0xff]  }
 0x17e   : > { %v1212_v44 = vsel %vm2629_vm15, %v1112_v23, 0  ;;  %v1244_v47 = vrot.slane %v1242_v38, 1  ;;  %v1714_v23 = vsel %vm1712_vm2, %v2174_v30, 0  ;;  %v2176_v38 = vld [vmem:[%s2959_s3 + $0x10] sm:$0xff]  }
 0x17f   : > { %v2646_v41 = vsel %vm2629_vm15, 0, %v1115_v35  ;;  %v1355_v42 = vsel %vm517_vm0, %v1353_v36, %v1354_v34  ;;  %v1239_v43 = vrot.slane %v1237_v37, 1  ;;  %v1351_v50 = vrot.slane %v1212_v44, 1  ;;  %2066 = vmatpush3.bf16.msra.mxu1 %v1714_v23 }
 0x180   : > { %1376 = vrot.lane.b32.xlu1 %v1355_v42, %s2223_s12  ;;  %v1350_v45 = vrot.slane %v2646_v41, 1  ;;  %v1225_v60 = vshll.u32 %v2646_v41, 16  ;;  %v1223_v10 = vshrl.u32 %v2646_v41, 16  ;;  %v1230_v15 = vshll.u32 %v1212_v44, 16  ;;  %2067 = vmatprep.subr.bf16.mxu1 %v2175_v1 }
 0x181   : > { %1439 = vrot.lane.b32.xlu0 %v1355_v42, %s2227_s8  ;;  %v1240_v46 = vor.u32 %v1239_v43, %v1235_v40 }
 0x182   : > { %v1352_v52 = vsel %vm517_vm0, %v1350_v45, %v1351_v50  ;;  %v1227_v8 = vrot.slane %v1225_v60, 1  ;;  %v1232_v19 = vrot.slane %v1230_v15, 1  ;;  %v2177_v45 = vld [vmem:[%s2959_s3 + $0x8] sm:$0xff]  }
 0x183   : > { %v1245_v51 = vsel %vm376_vm1, %v1240_v46, %v1244_v47  ;;  %2068 = vmatpush3.bf16.msra.mxu1 %v2175_v1 }
 0x184   : > { %1320 = vrot.lane.b32.xlu1 %v1245_v51, %s2221_s10  ;;  %v1228_v18 = vor.u32 %v1227_v8, %v1223_v10  ;;  %2069 = vmatprep.subr.bf16.mxu1 %v2176_v38 }
 0x185   : > { %1374 = vrot.lane.b32.xlu0 %v1352_v52, %s2223_s12 }
 0x186   : > { %v1233_v21 = vsel %vm376_vm1, %v1228_v18, %v1232_v19 }
 0x187   : > { %2070 = vmatpush3.bf16.msra.mxu1 %v2176_v38 }
 0x188   : > { %2071 = vmatprep.subr.bf16.mxu1 %v2177_v45 }
 0x189   : > { %1419 = vrot.lane.b32.xlu0 %v1245_v51, %s2226_s27 }
 0x18b   : > { %v2051_v53 = vpop.f32.mrf.mxu0  ;;  %2072 = vmatpush3.bf16.msra.mxu1 %v2177_v45 }
 0x18c   : > { %v1013_v55 = vadd.f32 %v2051_v53, %v2623_v11 }
 0x18d   : > { %v1004_v54 = vpop.f32.mrf.mxu0 }
 0x18e   : > { %v1005_v57 = vadd.f32 %v2623_v11, %v1004_v54  ;;  %v1073_v61 = vmax.f32 %v1013_v55, 0.0 }
 0x18f   : > { %v2052_v56 = vpop.f32.mrf.mxu0 }
 0x190   : > { %v1016_v58 = vadd.f32 %v2052_v56, %v2623_v11  ;;  %v1071_v62 = vmax.f32 %v1005_v57, 0.0 }
 0x191   : > { %v1007_v59 = vpop.f32.mrf.mxu0 }
 0x192   : > { %v1074_v49 = vmax.f32 %v1016_v58, 0.0  ;;  %v1008_v48 = vadd.f32 %v2623_v11, %v1007_v59  ;;  %v2178_v58 = vld [vmem:[%s2959_s3] sm:$0xff]  }
 0x193   : > { %2073 = vmatprep.subr.bf16.mxu1 %v2178_v58 }
 0x194   : > { %v1102_v39 = vpack.c.bf16 %v1074_v49, %v1073_v61  ;;  %v1072_v63 = vmax.f32 %v1008_v48, 0.0  ;;  %2074 = vmatpush3.bf16.msra.mxu1 %v2178_v58 }
 0x196   : > { %v1131_v2 = vshrl.u32 %v1102_v39, 16  ;;  %v1101_v4 = vpack.c.bf16 %v1072_v63, %v1071_v62  ;;  %v1134_v6 = vshll.u32 %v1102_v39, 16 }
 0x198   : > { %v1133_v5 = vrot.slane %v1131_v2, 7  ;;  %v1124_v7 = vshrl.u32 %v1101_v4, 16  ;;  %v1127_v13 = vshll.u32 %v1101_v4, 16 }
 0x19a   : > { %v1136_v9 = vor.u32 %v1134_v6, %v1133_v5  ;;  %v1126_v12 = vrot.slane %v1124_v7, 7  ;;  %v1215_v20 = vsel %vm2629_vm15, %v1133_v5, 0 }
 0x19b   : > { %v1360_v26 = vrot.slane %v1215_v20, 1  ;;  %v1266_v32 = vshll.u32 %v1215_v20, 16 }
 0x19c   : > { %v1129_v16 = vor.u32 %v1127_v13, %v1126_v12  ;;  %v2667_v17 = vsel %vm2629_vm15, 0, %v1136_v9  ;;  %v2687_v27 = vsel %vm2629_vm15, %v1126_v12, 0 }
 0x19d   : > { %1395 = vrot.lane.b32.xlu0 %v2667_v17, %s2224_s13  ;;  %1458 = vrot.lane.b32.xlu1 %v2667_v17, %s2228_s9  ;;  %v1359_v24 = vrot.slane %v2667_v17, 1  ;;  %v1261_v25 = vshll.u32 %v2667_v17, 16  ;;  %v1357_v14 = vrot.slane %v2687_v27, 1  ;;  %v1259_v31 = vshrl.u32 %v2667_v17, 16 }
 0x19e   : > { %v2678_v22 = vsel %vm2629_vm15, 0, %v1129_v16  ;;  %v1268_v36 = vrot.slane %v1266_v32, 1  ;;  %v1254_v63 = vshll.u32 %v2687_v27, 16 }
 0x19f   : > { %v1361_v3 = vsel %vm517_vm0, %v1359_v24, %v1360_v26  ;;  %v1356_v0 = vrot.slane %v2678_v22, 1  ;;  %v1263_v29 = vrot.slane %v1261_v25, 1  ;;  %v1249_v57 = vshll.u32 %v2678_v22, 16 }
 0x1a0   : > { %v1247_v2 = vshrl.u32 %v2678_v22, 16  ;;  %v1256_v8 = vrot.slane %v1254_v63, 1 }
 0x1a1   : > { %1318 = vrot.lane.b32.xlu0 %v1233_v21, %s2221_s10  ;;  %1393 = vrot.lane.b32.xlu1 %v2678_v22, %s2224_s13  ;;  %v1358_v34 = vsel %vm517_vm0, %v1356_v0, %v1357_v14  ;;  %v1264_v35 = vor.u32 %v1263_v29, %v1259_v31  ;;  %v1251_v39 = vrot.slane %v1249_v57, 1 }
 0x1a3   : > { %v1269_v40 = vsel %vm376_vm1, %v1264_v35, %v1268_v36  ;;  %v1252_v6 = vor.u32 %v1251_v39, %v1247_v2 }
 0x1a5   : > { %1456 = vrot.lane.b32.xlu0 %v2678_v22, %s2228_s9  ;;  %1380 = vrot.lane.b32.xlu1 %v1361_v3, %s2223_s12  ;;  %v1257_v9 = vsel %vm376_vm1, %v1252_v6, %v1256_v8 }
 0x1a9   : > { %1506 = vrot.lane.b32.xlu0 %v1361_v3, %s2229_s17  ;;  %1441 = vrot.lane.b32.xlu1 %v1358_v34, %s2227_s8 }
 0x1ab   : > { %v2055_v37 = vpop.f32.mrf.mxu0 }
 0x1ac   : > { %v1029_v43 = vadd.f32 %v2055_v37, %v2623_v11 }
 0x1ad   : > { %1443 = vrot.lane.b32.xlu0 %v1361_v3, %s2227_s8  ;;  %1486 = vrot.lane.b32.xlu1 %v1269_v40, %s2230_s29  ;;  %v1020_v42 = vpop.f32.mrf.mxu0 }
 0x1ae   : > { %v1021_v46 = vadd.f32 %v2623_v11, %v1020_v42  ;;  %v1077_v51 = vmax.f32 %v1029_v43, 0.0 }
 0x1af   : > { %v2056_v44 = vpop.f32.mrf.mxu0 }
 0x1b0   : > { %v1032_v47 = vadd.f32 %v2056_v44, %v2623_v11  ;;  %v1075_v54 = vmax.f32 %v1021_v46, 0.0 }
 0x1b1   : > { %1504 = vrot.lane.b32.xlu0 %v1358_v34, %s2229_s17  ;;  %1324 = vrot.lane.b32.xlu1 %v1269_v40, %s2221_s10  ;;  %v1023_v50 = vpop.f32.mrf.mxu0 }
 0x1b2   : > { %v1078_v52 = vmax.f32 %v1032_v47, 0.0  ;;  %v1024_v53 = vadd.f32 %v2623_v11, %v1023_v50 }
 0x1b4   : > { %v1104_v55 = vpack.c.bf16 %v1078_v52, %v1077_v51  ;;  %v1076_v56 = vmax.f32 %v1024_v53, 0.0 }
 0x1b5   : > { %1378 = vrot.lane.b32.xlu0 %v1358_v34, %s2223_s12 }
 0x1b6   : > { %v1145_v59 = vshrl.u32 %v1104_v55, 16  ;;  %v1103_v61 = vpack.c.bf16 %v1076_v56, %v1075_v54  ;;  %v1148_v48 = vshll.u32 %v1104_v55, 16 }
 0x1b8   : > { %v1147_v49 = vrot.slane %v1145_v59, 7  ;;  %v1138_v62 = vshrl.u32 %v1103_v61, 16  ;;  %v1141_v7 = vshll.u32 %v1103_v61, 16 }
 0x1b9   : > { %1423 = vrot.lane.b32.xlu0 %v1269_v40, %s2226_s27 }
 0x1ba   : > { %v1150_v60 = vor.u32 %v1148_v48, %v1147_v49  ;;  %v1140_v4 = vrot.slane %v1138_v62, 7  ;;  %v1217_v12 = vsel %vm2629_vm15, %v1147_v49, 0 }
 0x1bb   : > { %v1366_v16 = vrot.slane %v1217_v12, 1  ;;  %v1290_v29 = vshll.u32 %v1217_v12, 16 }
 0x1bc   : > { %v2730_v5 = vsel %vm2629_vm15, 0, %v1150_v60  ;;  %v1143_v10 = vor.u32 %v1141_v7, %v1140_v4  ;;  %v1216_v20 = vsel %vm2629_vm15, %v1140_v4, 0 }
 0x1bd   : > { %1399 = vrot.lane.b32.xlu0 %v2730_v5, %s2224_s13  ;;  %1462 = vrot.lane.b32.xlu1 %v2730_v5, %s2228_s9  ;;  %v1365_v15 = vrot.slane %v2730_v5, 1  ;;  %v1285_v19 = vshll.u32 %v2730_v5, 16  ;;  %v1363_v3 = vrot.slane %v1216_v20, 1  ;;  %v1283_v0 = vshrl.u32 %v2730_v5, 16 }
 0x1be   : > { %v2743_v13 = vsel %vm2629_vm15, 0, %v1143_v10  ;;  %v1292_v37 = vrot.slane %v1290_v29, 1  ;;  %v1278_v55 = vshll.u32 %v1216_v20, 16 }
 0x1bf   : > { %v1367_v18 = vsel %vm517_vm0, %v1365_v15, %v1366_v16  ;;  %v1362_v24 = vrot.slane %v2743_v13, 1  ;;  %v1287_v25 = vrot.slane %v1285_v19, 1  ;;  %v1273_v38 = vshll.u32 %v2743_v13, 16 }
 0x1c0   : > { %v1271_v54 = vshrl.u32 %v2743_v13, 16  ;;  %v1280_v61 = vrot.slane %v1278_v55, 1 }
 0x1c1   : > { %1484 = vrot.lane.b32.xlu0 %v1257_v9, %s2230_s29  ;;  %1421 = vrot.lane.b32.xlu1 %v1257_v9, %s2226_s27  ;;  %v1364_v32 = vsel %vm517_vm0, %v1362_v24, %v1363_v3  ;;  %v1288_v23 = vor.u32 %v1287_v25, %v1283_v0  ;;  %v1275_v52 = vrot.slane %v1273_v38, 1 }
 0x1c3   : > { %v1293_v44 = vsel %vm376_vm1, %v1288_v23, %v1292_v37  ;;  %v1276_v58 = vor.u32 %v1275_v52, %v1271_v54 }
 0x1c5   : > { %1322 = vrot.lane.b32.xlu1 %v1257_v9, %s2221_s10  ;;  %1460 = vrot.lane.b32.xlu0 %v2743_v13, %s2228_s9  ;;  %v1281_v48 = vsel %vm376_vm1, %v1276_v58, %v1280_v61  ;;  %v1095_v9 = vstv %s1094_s14 }
 0x1c6   : > { %vm1096_vm3 = vcmp.eq.s32.totalorder %v1095_v9, 1 }
 0x1c9   : > { %1510 = vrot.lane.b32.xlu0 %v1367_v18, %s2229_s17  ;;  %1397 = vrot.lane.b32.xlu1 %v2743_v13, %s2224_s13 }
 0x1cb   : > { %v2059_v21 = vpop.f32.mrf.mxu0 }
 0x1cc   : > { %v1045_v27 = vadd.f32 %v2059_v21, %v2623_v11 }
 0x1cd   : > { %1447 = vrot.lane.b32.xlu0 %v1367_v18, %s2227_s8  ;;  %1384 = vrot.lane.b32.xlu1 %v1367_v18, %s2223_s12  ;;  %v1036_v26 = vpop.f32.mrf.mxu0 }
 0x1ce   : > { %v1037_v14 = vadd.f32 %v2623_v11, %v1036_v26  ;;  %v1081_v34 = vmax.f32 %v1045_v27, 0.0 }
 0x1cf   : > { %v2060_v30 = vpop.f32.mrf.mxu0 }
 0x1d0   : > { %v1048_v31 = vadd.f32 %v2060_v30, %v2623_v11  ;;  %v1079_v40 = vmax.f32 %v1037_v14, 0.0 }
 0x1d1   : > { %1508 = vrot.lane.b32.xlu0 %v1364_v32, %s2229_s17  ;;  %1445 = vrot.lane.b32.xlu1 %v1364_v32, %s2227_s8  ;;  %v1039_v1 = vpop.f32.mrf.mxu0 }
 0x1d2   : > { %v1082_v35 = vmax.f32 %v1048_v31, 0.0  ;;  %v1040_v36 = vadd.f32 %v2623_v11, %v1039_v1 }
 0x1d4   : > { %v1106_v42 = vpack.c.bf16 %v1082_v35, %v1081_v34  ;;  %v1080_v43 = vmax.f32 %v1040_v36, 0.0 }
 0x1d5   : > { %1382 = vrot.lane.b32.xlu0 %v1364_v32, %s2223_s12  ;;  %1490 = vrot.lane.b32.xlu1 %v1293_v44, %s2230_s29 }
 0x1d6   : > { %v1159_v45 = vshrl.u32 %v1106_v42, 16  ;;  %v1105_v46 = vpack.c.bf16 %v1080_v43, %v1079_v40  ;;  %v1162_v50 = vshll.u32 %v1106_v42, 16 }
 0x1d8   : > { %v1161_v47 = vrot.slane %v1159_v45, 7  ;;  %v1152_v51 = vshrl.u32 %v1105_v46, 16  ;;  %v1155_v59 = vshll.u32 %v1105_v46, 16 }
 0x1d9   : > { %1427 = vrot.lane.b32.xlu0 %v1293_v44, %s2226_s27  ;;  %1328 = vrot.lane.b32.xlu1 %v1293_v44, %s2221_s10 }
 0x1da   : > { %v1164_v53 = vor.u32 %v1162_v50, %v1161_v47  ;;  %v1154_v56 = vrot.slane %v1152_v51, 7  ;;  %v1219_v62 = vsel %vm2629_vm15, %v1161_v47, 0 }
 0x1db   : > { %v1372_v60 = vrot.slane %v1219_v62, 1  ;;  %v1314_v26 = vshll.u32 %v1219_v62, 16 }
 0x1dc   : > { %v2776_v57 = vsel %vm2629_vm15, 0, %v1164_v53  ;;  %v1157_v49 = vor.u32 %v1155_v59, %v1154_v56  ;;  %v1218_v10 = vsel %vm2629_vm15, %v1154_v56, 0 }
 0x1dd   : > { %1403 = vrot.lane.b32.xlu0 %v2776_v57, %s2224_s13  ;;  %1466 = vrot.lane.b32.xlu1 %v2776_v57, %s2228_s9  ;;  %v1371_v63 = vrot.slane %v2776_v57, 1  ;;  %v1309_v6 = vshll.u32 %v2776_v57, 16  ;;  %v1369_v24 = vrot.slane %v1218_v10, 1  ;;  %v1307_v25 = vshrl.u32 %v2776_v57, 16 }
 0x1de   : > { %v2789_v39 = vsel %vm2629_vm15, 0, %v1157_v49  ;;  %v1316_v34 = vrot.slane %v1314_v26, 1  ;;  %v1302_v42 = vshll.u32 %v1218_v10, 16 }
 0x1df   : > { %v1373_v4 = vsel %vm517_vm0, %v1371_v63, %v1372_v60  ;;  %v1368_v15 = vrot.slane %v2789_v39, 1  ;;  %v1311_v16 = vrot.slane %v1309_v6, 1  ;;  %v1297_v30 = vshll.u32 %v2789_v39, 16 }
 0x1e0   : > { %v1295_v40 = vshrl.u32 %v2789_v39, 16  ;;  %v1304_v51 = vrot.slane %v1302_v42, 1 }
 0x1e1   : > { %1488 = vrot.lane.b32.xlu0 %v1281_v48, %s2230_s29  ;;  %1425 = vrot.lane.b32.xlu1 %v1281_v48, %s2226_s27  ;;  %v1370_v0 = vsel %vm517_vm0, %v1368_v15, %v1369_v24  ;;  %v1312_v29 = vor.u32 %v1311_v16, %v1307_v25  ;;  %v1299_v37 = vrot.slane %v1297_v30, 1 }
 0x1e3   : > { %v1317_v36 = vsel %vm376_vm1, %v1312_v29, %v1316_v34  ;;  %v1300_v45 = vor.u32 %v1299_v37, %v1295_v40 }
 0x1e5   : > { %1326 = vrot.lane.b32.xlu1 %v1281_v48, %s2221_s10  ;;  %1464 = vrot.lane.b32.xlu0 %v2789_v39, %s2228_s9  ;;  %v1305_v55 = vsel %vm376_vm1, %v1300_v45, %v1304_v51 }
 0x1e8   : > { %v2063_v2 = vpop.f32.mrf.mxu0 }
 0x1e9   : > { %v1061_v7 = vadd.f32 %v2063_v2, %v2623_v11  ;;  %1514 = vrot.lane.b32.xlu0 %v1373_v4, %s2229_s17  ;;  %1401 = vrot.lane.b32.xlu1 %v2789_v39, %s2224_s13 }
 0x1ea   : > { %v1052_v8 = vpop.f32.mrf.mxu0 }
 0x1eb   : > { %v1085_v18 = vmax.f32 %v1061_v7, 0.0  ;;  %v1053_v19 = vadd.f32 %v2623_v11, %v1052_v8 }
 0x1ec   : > { %v2064_v12 = vpop.f32.mrf.mxu0 }
 0x1ed   : > { %v1064_v20 = vadd.f32 %v2064_v12, %v2623_v11  ;;  %1451 = vrot.lane.b32.xlu0 %v1373_v4, %s2227_s8  ;;  %1388 = vrot.lane.b32.xlu1 %v1373_v4, %s2223_s12  ;;  %v1097_v14 = vsel %vm1096_vm3, %v1085_v18, 0.0  ;;  %v1083_v31 = vmax.f32 %v1053_v19, 0.0 }
 0x1ee   : > { %v1055_v21 = vpop.f32.mrf.mxu0 }
 0x1ef   : > { %v1086_v27 = vmax.f32 %v1064_v20, 0.0  ;;  %v1056_v3 = vadd.f32 %v2623_v11, %v1055_v21  ;;  %v2820_v50 = vpop.permute.xlu0 %1391 }
 0x1f1   : > { %v1098_v32 = vsel %vm1096_vm3, %v1086_v27, 0.0  ;;  %v1084_v23 = vmax.f32 %v1056_v3, 0.0  ;;  %1512 = vrot.lane.b32.xlu0 %v1370_v0, %s2229_s17  ;;  %1449 = vrot.lane.b32.xlu1 %v1370_v0, %s2227_s8 }
 0x1f2   : > { %v1108_v1 = vpack.c.bf16 %v1098_v32, %v1097_v14  ;;  %v1377_v7 = vpop.permute.xlu1 %1376 }
 0x1f3   : > { %v1107_v35 = vpack.c.bf16 %v1084_v23, %v1083_v31  ;;  %v1440_v48 = vpop.permute.xlu0 %1439 }
 0x1f4   : > { %v1173_v11 = vshrl.u32 %v1108_v1, 16  ;;  %v1176_v52 = vshll.u32 %v1108_v1, 16 }
 0x1f5   : > { %v1166_v38 = vshrl.u32 %v1107_v35, 16  ;;  %1386 = vrot.lane.b32.xlu0 %v1370_v0, %s2223_s12  ;;  %1494 = vrot.lane.b32.xlu1 %v1317_v36, %s2230_s29  ;;  %v1169_v44 = vshll.u32 %v1107_v35, 16  ;;  %s1957_s12 = sshll.u32 %s2975_s19, 1 }
 0x1f6   : > { %v1175_v46 = vrot.slane %v1173_v11, 7  ;;  %v1321_v19 = vpop.permute.xlu1 %1320 }
 0x1f7   : > { %v1168_v43 = vrot.slane %v1166_v38, 7  ;;  %v1375_v8 = vpop.permute.xlu0 %1374 }
 0x1f8   : > { %v1178_v58 = vor.u32 %v1176_v52, %v1175_v46  ;;  %v1221_v9 = vsel %vm2629_vm15, %v1175_v46, 0 }
 0x1f9   : > { %v1171_v47 = vor.u32 %v1169_v44, %v1168_v43  ;;  %1431 = vrot.lane.b32.xlu0 %v1317_v36, %s2226_s27  ;;  %1332 = vrot.lane.b32.xlu1 %v1317_v36, %s2221_s10  ;;  %v1220_v53 = vsel %vm2629_vm15, %v1168_v43, 0  ;;  %v1480_v18 = vshll.u32 %v1221_v9, 16  ;;  %v1502_v29 = vrot.slane %v1221_v9, 1 }
 0x1fa   : > { %v1415_v49 = vshll.u32 %v1220_v53, 16  ;;  %v1211_v63 = vsel %vm2629_vm15, 0, %v1178_v58  ;;  %v1437_v10 = vrot.slane %v1220_v53, 1  ;;  %v1523_v44 = vsel %vm755_vm4, %v2637_v33, %v1321_v19 }
 0x1fb   : > { %v1210_v54 = vsel %vm2629_vm15, 0, %v1171_v47  ;;  %v1475_v2 = vshll.u32 %v1211_v63, 16  ;;  %v1473_v16 = vshrl.u32 %v1211_v63, 16  ;;  %v1420_v20 = vpop.permute.xlu0 %1419  ;;  %v1482_v24 = vrot.slane %v1480_v18, 1 }
 0x1fc   : > { %v1410_v56 = vshll.u32 %v1210_v54, 16  ;;  %v1408_v59 = vshrl.u32 %v1210_v54, 16  ;;  %v1417_v60 = vrot.slane %v1415_v49, 1  ;;  %v1436_v6 = vrot.slane %v1210_v54, 1 }
 0x1fd   : > { %1492 = vrot.lane.b32.xlu0 %v1305_v55, %s2230_s29  ;;  %1429 = vrot.lane.b32.xlu1 %v1305_v55, %s2226_s27  ;;  %v1477_v12 = vrot.slane %v1475_v2, 1  ;;  %v1501_v0 = vrot.slane %v1211_v63, 1  ;;  %v1539_v47 = vsel %vm797_vm6, %v1523_v44, %v1377_v7 }
 0x1fe   : > { %v1412_v61 = vrot.slane %v1410_v56, 1  ;;  %v1438_v15 = vsel %vm517_vm0, %v1436_v6, %v1437_v10 }
 0x1ff   : > { %v1478_v21 = vor.u32 %v1477_v12, %v1473_v16  ;;  %v1503_v14 = vsel %vm517_vm0, %v1501_v0, %v1502_v29  ;;  %vm1584_vm0 = vcmask 326656  }
 0x200   : > { %v1413_v62 = vor.u32 %v1412_v61, %v1408_v59 }
 0x201   : > { %1330 = vrot.lane.b32.xlu1 %v1305_v55, %s2221_s10  ;;  %1468 = vrot.lane.b32.xlu0 %v1210_v54, %s2228_s9  ;;  %v1483_v28 = vsel %vm376_vm1, %v1478_v21, %v1482_v24 }
 0x202   : > { %v1418_v4 = vsel %vm376_vm1, %v1413_v62, %v1417_v60  ;;  %vm1601_vm1 = vcmask 392192  }
 0x205   : > { %1470 = vrot.lane.b32.xlu1 %v1211_v63, %s2228_s9  ;;  %1496 = vrot.lane.b32.xlu0 %v1418_v4, %s2230_s29 }
 0x209   : > { %1405 = vrot.lane.b32.xlu1 %v1210_v54, %s2224_s13  ;;  %1516 = vrot.lane.b32.xlu0 %v1438_v15, %s2229_s17  ;;  %s256_s13 = sadd.s32 %s1957_s12, %s2299_s25 }
 0x20d   : > { %1453 = vrot.lane.b32.xlu1 %v1438_v15, %s2227_s8 }
 0x20f   : > { %v1459_v25 = vpop.permute.xlu1 %1458  ;;  %v1396_v26 = vpop.permute.xlu0 %1395 }
 0x211   : > { %1498 = vrot.lane.b32.xlu1 %v1483_v28, %s2230_s29 }
 0x213   : > { %v1394_v27 = vpop.permute.xlu1 %1393  ;;  %v1319_v3 = vpop.permute.xlu0 %1318 }
 0x214   : > { %v1521_v35 = vsel %vm755_vm4, %v2646_v41, %v1319_v3 }
 0x215   : > { %1433 = vrot.lane.b32.xlu1 %v1418_v4, %s2226_s27  ;;  %v1537_v37 = vsel %vm797_vm6, %v1521_v35, %v1375_v8  ;;  %s1958_s27 = sshll.u32 %s256_s13, 3 }
 0x216   : > { %v1553_v38 = vsel %vm839_vm8, %v1537_v37, %v2820_v50  ;;  %v1555_v50 = vsel %vm839_vm8, %v1539_v47, %v1394_v27  ;;  %s258_s15 = scalar_lea.vmem %s2961_s5, %s1958_s27 }
 0x217   : > { %v1457_v30 = vpop.permute.xlu0 %1456  ;;  %v1381_v31 = vpop.permute.xlu1 %1380  ;;  %v1569_v43 = vsel %vm881_vm10, %v1553_v38, %v1420_v20 }
 0x218   : > { %v1586_v41 = vsel %vm1584_vm0, %v1569_v43, %v1440_v48 }
 0x219   : > { %1518 = vrot.lane.b32.xlu1 %v1503_v14, %s2229_s17  ;;  %v1603_v51 = vsel %vm1601_vm1, %v1586_v41, %v1457_v30 }
 0x21b   : > { %v1507_v32 = vpop.permute.xlu0 %1506  ;;  %v1442_v23 = vpop.permute.xlu1 %1441 }
 0x21f   : > { %v1444_v1 = vpop.permute.xlu0 %1443  ;;  %v1487_v36 = vpop.permute.xlu1 %1486 }
 0x223   : > { %v1505_v34 = vpop.permute.xlu0 %1504  ;;  %v1325_v40 = vpop.permute.xlu1 %1324 }
 0x224   : > { %v1527_v19 = vsel %vm755_vm4, %v2667_v17, %v1325_v40 }
 0x227   : > { %v1379_v11 = vpop.permute.xlu0 %1378 }
 0x22b   : > { %v1424_v42 = vpop.permute.xlu0 %1423 }
 0x22f   : > { %v1463_v45 = vpop.permute.xlu1 %1462  ;;  %v2857_v46 = vpop.permute.xlu0 %1399 }
 0x233   : > { %v1422_v52 = vpop.permute.xlu1 %1421  ;;  %v1485_v53 = vpop.permute.xlu0 %1484 }
 0x234   : > { %v1571_v54 = vsel %vm881_vm10, %v1555_v50, %v1422_v52  ;;  %v1620_v33 = vsel %vm1618_vm5, %v1603_v51, %v1485_v53 }
 0x235   : > { %v1588_v55 = vsel %vm1584_vm0, %v1571_v54, %v1442_v23  ;;  %v1637_v56 = vsel %vm1635_vm7, %v1620_v33, %v1505_v34 }
 0x236   : > { %v1605_v58 = vsel %vm1601_vm1, %v1588_v55, %v1459_v25  ;;  %2075 = vmatprep.mubr.msk.bf16.mxu1 %vm1695_vm9, %v1637_v56  ;;  %v1543_v25 = vsel %vm797_vm6, %v1527_v19, %v1381_v31 }
 0x237   : > { %v1323_v59 = vpop.permute.xlu1 %1322  ;;  %v1461_v61 = vpop.permute.xlu0 %1460  ;;  %v1622_v49 = vsel %vm1618_vm5, %v1605_v58, %v1487_v36 }
 0x238   : > { %v1639_v48 = vsel %vm1635_vm7, %v1622_v49, %v1507_v32  ;;  %v1525_v7 = vsel %vm755_vm4, %v2678_v22, %v1323_v59 }
 0x239   : > { %2076 = vmatmul.mubr.msk.bf16.vlgmr.msra.gmra.mxu1 %vm1695_vm9, %v1639_v48  ;;  %v1541_v8 = vsel %vm797_vm6, %v1525_v7, %v1379_v11 }
 0x23a   : > { %v1557_v12 = vsel %vm839_vm8, %v1541_v8, %v1396_v26 }
 0x23b   : > { %v1398_v62 = vpop.permute.xlu1 %1397  ;;  %v1511_v63 = vpop.permute.xlu0 %1510  ;;  %v1573_v18 = vsel %vm881_vm10, %v1557_v12, %v1424_v42 }
 0x23c   : > { %v1590_v24 = vsel %vm1584_vm0, %v1573_v18, %v1444_v1  ;;  %v1559_v28 = vsel %vm839_vm8, %v1543_v25, %v1398_v62 }
 0x23d   : > { %v1607_v22 = vsel %vm1601_vm1, %v1590_v24, %v1461_v61 }
 0x23f   : > { %v1385_v60 = vpop.permute.xlu1 %1384  ;;  %v1448_v2 = vpop.permute.xlu0 %1447 }
 0x243   : > { %v1446_v4 = vpop.permute.xlu1 %1445  ;;  %v1509_v6 = vpop.permute.xlu0 %1508 }
 0x247   : > { %v1491_v10 = vpop.permute.xlu1 %1490  ;;  %v1383_v9 = vpop.permute.xlu0 %1382 }
 0x24b   : > { %v1329_v15 = vpop.permute.xlu1 %1328  ;;  %v1428_v16 = vpop.permute.xlu0 %1427 }
 0x24c   : > { %v1531_v41 = vsel %vm755_vm4, %v2730_v5, %v1329_v15 }
 0x24f   : > { %v1467_v20 = vpop.permute.xlu1 %1466  ;;  %v1404_v21 = vpop.permute.xlu0 %1403 }
 0x253   : > { %v1426_v27 = vpop.permute.xlu1 %1425  ;;  %v1489_v3 = vpop.permute.xlu0 %1488 }
 0x254   : > { %v1575_v26 = vsel %vm881_vm10, %v1559_v28, %v1426_v27  ;;  %v1624_v0 = vsel %vm1618_vm5, %v1607_v22, %v1489_v3 }
 0x255   : > { %v1592_v29 = vsel %vm1584_vm0, %v1575_v26, %v1446_v4  ;;  %v1641_v17 = vsel %vm1635_vm7, %v1624_v0, %v1509_v6  ;;  %v1997_v26 = vld [vmem:[%s2960_s4] ss:$0 sm:$0xff] }
 0x256   : > { %v1609_v30 = vsel %vm1601_vm1, %v1592_v29, %v1463_v45  ;;  %2079 = vmatprep.mubr.msk.bf16.mxu1 %vm1695_vm9, %v1641_v17 }
 0x257   : > { %v1327_v14 = vpop.permute.xlu1 %1326  ;;  %v1465_v31 = vpop.permute.xlu0 %1464  ;;  %v1626_v32 = vsel %vm1618_vm5, %v1609_v30, %v1491_v10 }
 0x258   : > { %v1643_v23 = vsel %vm1635_vm7, %v1626_v32, %v1511_v63  ;;  %v1529_v37 = vsel %vm755_vm4, %v2743_v13, %v1327_v14  ;;  %v1547_v13 = vsel %vm797_vm6, %v1531_v41, %v1385_v60 }
 0x259   : > { %2080 = vmatmul.mubr.msk.bf16.gmra.mxu1 %vm1695_vm9, %v1643_v23  ;;  %v1545_v11 = vsel %vm797_vm6, %v1529_v37, %v1383_v9 }
 0x25a   : > { %v1561_v42 = vsel %vm839_vm8, %v1545_v11, %v2857_v46 }
 0x25b   : > { %v1402_v1 = vpop.permute.xlu1 %1401  ;;  %v1515_v34 = vpop.permute.xlu0 %1514  ;;  %v1577_v45 = vsel %vm881_vm10, %v1561_v42, %v1428_v16 }
 0x25c   : > { %v1594_v51 = vsel %vm1584_vm0, %v1577_v45, %v1448_v2  ;;  %v1563_v53 = vsel %vm839_vm8, %v1547_v13, %v1402_v1 }
 0x25d   : > { %v1611_v52 = vsel %vm1601_vm1, %v1594_v51, %v1465_v31 }
 0x25f   : > { %v1389_v35 = vpop.permute.xlu1 %1388  ;;  %v1452_v36 = vpop.permute.xlu0 %1451 }
 0x263   : > { %v1450_v38 = vpop.permute.xlu1 %1449  ;;  %v1513_v40 = vpop.permute.xlu0 %1512 }
 0x267   : > { %v1495_v43 = vpop.permute.xlu1 %1494  ;;  %v1387_v44 = vpop.permute.xlu0 %1386 }
 0x26b   : > { %v1333_v47 = vpop.permute.xlu1 %1332  ;;  %v1432_v50 = vpop.permute.xlu0 %1431 }
 0x26c   : > { %v1535_v16 = vsel %vm755_vm4, %v2776_v57, %v1333_v47 }
 0x26d   : > { %v1551_v19 = vsel %vm797_vm6, %v1535_v16, %v1389_v35 }
 0x26f   : > { %v1430_v54 = vpop.permute.xlu1 %1429  ;;  %v1493_v33 = vpop.permute.xlu0 %1492 }
 0x270   : > { %v1579_v46 = vsel %vm881_vm10, %v1563_v53, %v1430_v54  ;;  %v1628_v55 = vsel %vm1618_vm5, %v1611_v52, %v1493_v33 }
 0x271   : > { %v1596_v56 = vsel %vm1584_vm0, %v1579_v46, %v1450_v38  ;;  %v1645_v5 = vsel %vm1635_vm7, %v1628_v55, %v1513_v40 }
 0x272   : > { %v1613_v58 = vsel %vm1601_vm1, %v1596_v56, %v1467_v20  ;;  %2083 = vmatprep.mubr.msk.bf16.mxu1 %vm1695_vm9, %v1645_v5 }
 0x273   : > { %v1331_v59 = vpop.permute.xlu1 %1330  ;;  %v1469_v61 = vpop.permute.xlu0 %1468  ;;  %v1630_v49 = vsel %vm1618_vm5, %v1613_v58, %v1495_v43 }
 0x274   : > { %v1533_v48 = vsel %vm755_vm4, %v2789_v39, %v1331_v59  ;;  %v1647_v62 = vsel %vm1635_vm7, %v1630_v49, %v1515_v34 }
 0x275   : > { %v1549_v63 = vsel %vm797_vm6, %v1533_v48, %v1387_v44  ;;  %2084 = vmatmul.mubr.msk.bf16.gmra.mxu1 %vm1695_vm9, %v1647_v62 }
 0x276   : > { %v1565_v60 = vsel %vm839_vm8, %v1549_v63, %v1404_v21 }
 0x277   : > { %v1581_v2 = vsel %vm881_vm10, %v1565_v60, %v1432_v50  ;;  %v1471_v4 = vpop.permute.xlu1 %1470  ;;  %v1497_v6 = vpop.permute.xlu0 %1496 }
 0x278   : > { %v1598_v7 = vsel %vm1584_vm0, %v1581_v2, %v1452_v36 }
 0x279   : > { %v1615_v8 = vsel %vm1601_vm1, %v1598_v7, %v1469_v61 }
 0x27a   : > { %v1632_v10 = vsel %vm1618_vm5, %v1615_v8, %v1497_v6 }
 0x27b   : > { %v1406_v9 = vpop.permute.xlu1 %1405  ;;  %v1517_v39 = vpop.permute.xlu0 %1516 }
 0x27c   : > { %v1649_v12 = vsel %vm1635_vm7, %v1632_v10, %v1517_v39  ;;  %v1567_v20 = vsel %vm839_vm8, %v1551_v19, %v1406_v9 }
 0x27d   : > { %2087 = vmatprep.mubr.msk.bf16.mxu1 %vm1695_vm9, %v1649_v12 }
 0x27f   : > { %v1454_v15 = vpop.permute.xlu1 %1453 }
 0x283   : > { %v1499_v18 = vpop.permute.xlu1 %1498 }
 0x287   : > { %v1434_v21 = vpop.permute.xlu1 %1433 }
 0x288   : > { %v1583_v24 = vsel %vm881_vm10, %v1567_v20, %v1434_v21 }
 0x289   : > { %v1600_v25 = vsel %vm1584_vm0, %v1583_v24, %v1454_v15 }
 0x28a   : > { %v1617_v22 = vsel %vm1601_vm1, %v1600_v25, %v1471_v4 }
 0x28b   : > { %v1634_v28 = vsel %vm1618_vm5, %v1617_v22, %v1499_v18  ;;  %v1519_v27 = vpop.permute.xlu1 %1518 }
 0x28c   : > { %v1651_v3 = vsel %vm1635_vm7, %v1634_v28, %v1519_v27 }
 0x28d   : > { %2088 = vmatmul.mubr.msk.bf16.gmra.mxu1 %vm1695_vm9, %v1651_v3 }
 0x2f9   : > { %v2077_v57 = vpop.f32.mrf.mxu1 }
 0x2fa   : > { %v1759_v32 = vadd.f32 %v2077_v57, %v1997_v26 }
 0x2fb   : > { %v1750_v0 = vpop.f32.mrf.mxu1 }
 0x2fc   : > { %v1751_v29 = vadd.f32 %v1997_v26, %v1750_v0  ;;  %v1815_v1 = vmax.f32 %v1759_v32, 0.0 }
 0x2fd   : > { %v2078_v17 = vpop.f32.mrf.mxu1 }
 0x2fe   : > { %v1813_v30 = vmax.f32 %v1751_v29, 0.0  ;;  %v1762_v34 = vadd.f32 %v2078_v17, %v1997_v26 }
 0x2ff   : > { %v1753_v14 = vpop.f32.mrf.mxu1 }
 0x300   : > { %v1754_v31 = vadd.f32 %v1997_v26, %v1753_v14  ;;  %1829 = vxpose.xlu0.b32.start [1/16] (narrow) %v1813_v30, 8  ;;  %v1816_v35 = vmax.f32 %v1762_v34, 0.0 }
 0x302   : > { %v1814_v23 = vmax.f32 %v1754_v31, 0.0 }
 0x304   : > { %1830 = vxpose.xlu0.b32.cont [2/16] (narrow) %v1814_v23, 8 }
 0x308   : > { %1831 = vxpose.xlu0.b32.cont [3/16] (narrow) %v1815_v1, 8 }
 0x30c   : > { %1832 = vxpose.xlu0.b32.cont [4/16] (narrow) %v1816_v35, 8 }
 0x319   : > { %v2081_v36 = vpop.f32.mrf.mxu1 }
 0x31a   : > { %v1775_v44 = vadd.f32 %v2081_v36, %v1997_v26 }
 0x31b   : > { %v1766_v37 = vpop.f32.mrf.mxu1 }
 0x31c   : > { %v1767_v11 = vadd.f32 %v1997_v26, %v1766_v37  ;;  %v1819_v41 = vmax.f32 %v1775_v44, 0.0 }
 0x31d   : > { %v2082_v38 = vpop.f32.mrf.mxu1 }
 0x31e   : > { %v1817_v40 = vmax.f32 %v1767_v11, 0.0  ;;  %v1778_v47 = vadd.f32 %v2082_v38, %v1997_v26 }
 0x31f   : > { %v1769_v42 = vpop.f32.mrf.mxu1 }
 0x320   : > { %v1770_v43 = vadd.f32 %v1997_v26, %v1769_v42  ;;  %1833 = vxpose.xlu0.b32.cont [5/16] (narrow) %v1817_v40, 8  ;;  %v1820_v50 = vmax.f32 %v1778_v47, 0.0 }
 0x322   : > { %v1818_v45 = vmax.f32 %v1770_v43, 0.0 }
 0x324   : > { %1834 = vxpose.xlu0.b32.cont [6/16] (narrow) %v1818_v45, 8 }
 0x328   : > { %1835 = vxpose.xlu0.b32.cont [7/16] (narrow) %v1819_v41, 8 }
 0x32c   : > { %1836 = vxpose.xlu0.b32.cont [8/16] (narrow) %v1820_v50, 8 }
 0x335   : > { %v2085_v51 = vpop.f32.mrf.mxu1 }
 0x336   : > { %v1791_v55 = vadd.f32 %v2085_v51, %v1997_v26 }
 0x337   : > { %v1782_v13 = vpop.f32.mrf.mxu1 }
 0x338   : > { %v1783_v52 = vadd.f32 %v1997_v26, %v1782_v13  ;;  %v1823_v5 = vmax.f32 %v1791_v55, 0.0 }
 0x339   : > { %v2086_v53 = vpop.f32.mrf.mxu1 }
 0x33a   : > { %v1821_v54 = vmax.f32 %v1783_v52, 0.0  ;;  %v1794_v58 = vadd.f32 %v2086_v53, %v1997_v26 }
 0x33b   : > { %v1785_v33 = vpop.f32.mrf.mxu1 }
 0x33c   : > { %v1786_v46 = vadd.f32 %v1997_v26, %v1785_v33  ;;  %1837 = vxpose.xlu0.b32.cont [9/16] (narrow) %v1821_v54, 8  ;;  %v1824_v59 = vmax.f32 %v1794_v58, 0.0 }
 0x33e   : > { %v1822_v56 = vmax.f32 %v1786_v46, 0.0 }
 0x340   : > { %1838 = vxpose.xlu0.b32.cont [10/16] (narrow) %v1822_v56, 8 }
 0x344   : > { %1839 = vxpose.xlu0.b32.cont [11/16] (narrow) %v1823_v5, 8 }
 0x348   : > { %1840 = vxpose.xlu0.b32.cont [12/16] (narrow) %v1824_v59, 8 }
 0x34d   : > { %v2089_v61 = vpop.f32.mrf.mxu1 }
 0x34e   : > { %v1807_v4 = vadd.f32 %v2089_v61, %v1997_v26 }
 0x34f   : > { %v1798_v49 = vpop.f32.mrf.mxu1 }
 0x350   : > { %v1799_v48 = vadd.f32 %v1997_v26, %v1798_v49  ;;  %v1827_v7 = vmax.f32 %v1807_v4, 0.0 }
 0x351   : > { %v2090_v62 = vpop.f32.mrf.mxu1 }
 0x352   : > { %v1825_v63 = vmax.f32 %v1799_v48, 0.0  ;;  %v1810_v8 = vadd.f32 %v2090_v62, %v1997_v26 }
 0x353   : > { %v1801_v60 = vpop.f32.mrf.mxu1 }
 0x354   : > { %v1802_v2 = vadd.f32 %v1997_v26, %v1801_v60  ;;  %1841 = vxpose.xlu0.b32.cont [13/16] (narrow) %v1825_v63, 8  ;;  %v1828_v10 = vmax.f32 %v1810_v8, 0.0 }
 0x356   : > { %v1826_v6 = vmax.f32 %v1802_v2, 0.0 }
 0x358   : > { %1842 = vxpose.xlu0.b32.cont [14/16] (narrow) %v1826_v6, 8 }
 0x35c   : > { %1843 = vxpose.xlu0.b32.cont [15/16] (narrow) %v1827_v7, 8 }
 0x360   : > { %1844 = vxpose.xlu0.b32.end [16/16] (narrow) %v1828_v10, 8 }
 0x3a0   : > { %v1845_v9 = vpop.trf.xlu0 }
 0x3a1   : > { %1861 = vst [vmem:[%s258_s15] sm:$0xff] %v1845_v9 }
 0x3a2 PF: > { %s15_s22 = sadd.s32 1, %s2217_s22   ;;  %s2964_s18 = smov %s2209_s20 }
 0x3a3   : > { %p12_p8 = scmp.ge.s32.totalorder %s15_s22, 6   ;;  %s2965_s19 = smov %s2213_s21 }
 0x3a4   : > { %s2966_s20 = smov %s2969_s23  ;;  %s2967_s21 = smov %s2973_s24 }
 0x3a5   :  { %14 = sbr.rel (!%p12_p8) target bundleno = 3 (0x3), region = 70 }

</bundles_post_ra>
